<compile_context>
chip_gen: v5e
topology: v5e:2x2
jax: 0.10.0
libtpu: 0.0.40
codegen_flags: <defaults>
</compile_context>

<pallas_src>
import functools

import jax
import jax.numpy as jnp
import numpy as np
from jax import lax
from jax.experimental import pallas as pl
from jax.experimental.pallas import tpu as pltpu


# --------------------------------------------------------------------------------------
# Small helpers
# --------------------------------------------------------------------------------------

_TM_MAX = 256        # matmul rows per tile (multiple of 16 for bf16 sublane packing)
_TK_MAX = 512        # matmul reduction-dim tile
_ROWS_TILE = 1024    # row tile for elementwise / reduction kernels


def _round_up(x, m):
    return ((x + m - 1) // m) * m


def _pad2d(x, rows, cols):
    r, c = x.shape
    if r == rows and c == cols:
        return x
    return jnp.pad(x, ((0, rows - r), (0, cols - c)))


# --------------------------------------------------------------------------------------
# Pallas kernels
# --------------------------------------------------------------------------------------

def _matmul_bias_kernel(a_ref, b_ref, bias_ref, o_ref, acc_ref, *, apply_relu):
    """(M,K)@(K,N) + bias (+ optional ReLU).  grid = (M/tm, K/tk); B fully N-resident."""
    k = pl.program_id(1)

    @pl.when(k == 0)
    def _():
        acc_ref[...] = jnp.zeros_like(acc_ref)

    acc_ref[...] += jnp.dot(a_ref[...], b_ref[...],
                            preferred_element_type=jnp.float32)

    @pl.when(k == pl.num_programs(1) - 1)
    def _():
        y = acc_ref[...] + bias_ref[...]
        if apply_relu:
            y = jnp.maximum(y, 0.0)
        o_ref[...] = y.astype(o_ref.dtype)


def _bn_stats_kernel(x_ref, s_ref, s2_ref):
    """Tiled per-channel sum / sum-of-squares reduction over rows of an (M, C) slab."""
    @pl.when(pl.program_id(0) == 0)
    def _():
        s_ref[...] = jnp.zeros_like(s_ref)
        s2_ref[...] = jnp.zeros_like(s2_ref)

    x = x_ref[...]
    s_ref[...] += jnp.sum(x, axis=0, keepdims=True)
    s2_ref[...] += jnp.sum(x * x, axis=0, keepdims=True)


def _scale_shift_relu_kernel(x_ref, scale_ref, shift_ref, o_ref, *, apply_relu):
    """y = x * scale + shift (+ optional ReLU) -- BN normalization as a fused affine."""
    y = x_ref[...] * scale_ref[...] + shift_ref[...]
    if apply_relu:
        y = jnp.maximum(y, 0.0)
    o_ref[...] = y


def _max_taps_kernel(*refs):
    """Elementwise max over N_tap input blocks (maxpool over the 3x3 window taps)."""
    x_refs, o_ref = refs[:-1], refs[-1]
    m = x_refs[0][...]
    for r in x_refs[1:]:
        m = jnp.maximum(m, r[...])
    o_ref[...] = m


def _mean_hw_kernel(x_ref, o_ref):
    # (N, H*W, C) -> (N, C): AdaptiveAvgPool2d((1,1)) + Flatten.
    o_ref[...] = jnp.mean(x_ref[...], axis=1)


# --------------------------------------------------------------------------------------
# pallas_call wrappers
# --------------------------------------------------------------------------------------

def matmul_bias(a, b, bias, *, apply_relu=False):
    """out = a @ b + bias (optionally fused ReLU).

    Computed in bf16 on the MXU with an f32 accumulator.  The full (zero-padded)
    weight matrix and bias stay resident in VMEM across the M loop, so the grid is
    (M tiles, K tiles) only.  Tiles are sized to fit v5e/v6e/v7x scoped-VMEM defaults.
    """
    M, K = a.shape
    K2, N = b.shape
    assert K == K2

    TM = min(_TM_MAX, _round_up(M, 16))
    Mp = _round_up(M, TM)
    TK = min(_TK_MAX, _round_up(K, 128))
    Kp = _round_up(K, TK)
    Np = _round_up(N, 128)

    a_p = _pad2d(a.astype(jnp.bfloat16), Mp, Kp)
    b_p = _pad2d(b.astype(jnp.bfloat16), Kp, Np)
    bias_p = _pad2d(bias.reshape(1, -1).astype(jnp.float32), 1, Np)

    out = pl.pallas_call(
        functools.partial(_matmul_bias_kernel, apply_relu=apply_relu),
        out_shape=jax.ShapeDtypeStruct((Mp, Np), jnp.float32),
        grid_spec=pltpu.PrefetchScalarGridSpec(
            num_scalar_prefetch=0,
            grid=(Mp // TM, Kp // TK),
            in_specs=[
                pl.BlockSpec((TM, TK), lambda i, k: (i, k)),
                pl.BlockSpec((TK, Np), lambda i, k: (k, 0)),   # weights: N-resident
                pl.BlockSpec((1, Np), lambda i, k: (0, 0)),
            ],
            out_specs=pl.BlockSpec((TM, Np), lambda i, k: (i, 0)),
            scratch_shapes=[pltpu.VMEM((TM, Np), jnp.float32)],
        ),
        compiler_params=pltpu.CompilerParams(
            dimension_semantics=("parallel", "arbitrary")),
    )(a_p, b_p, bias_p)
    return out[:M, :N]


def batchnorm_nhwc(x, gamma, beta, *, relu, eps=1e-5):
    """Training-mode BatchNorm2d (batch statistics) over NHWC + optional fused ReLU.

    Pass 1 (tiled reduction): per-channel sum and sum-of-squares.
    Pass 2 (tiled elementwise): y = x * scale + shift (+ ReLU), with scale/shift
    computed from the sums by tiny (C,)-sized plain-JAX math.
    """
    N, H, W, C = x.shape
    M = N * H * W
    x2 = x.reshape(M, C)
    TR = min(_ROWS_TILE, _round_up(M, 8))
    Mp = _round_up(M, TR)
    if Mp != M:
        x2 = jnp.pad(x2, ((0, Mp - M), (0, 0)))   # zero rows do not disturb the sums

    s, s2 = pl.pallas_call(
        _bn_stats_kernel,
        out_shape=(jax.ShapeDtypeStruct((1, C), jnp.float32),
                   jax.ShapeDtypeStruct((1, C), jnp.float32)),
        grid_spec=pltpu.PrefetchScalarGridSpec(
            num_scalar_prefetch=0,
            grid=(Mp // TR,),
            in_specs=[pl.BlockSpec((TR, C), lambda i: (i, 0))],
            out_specs=[pl.BlockSpec((1, C), lambda i: (0, 0)),
                       pl.BlockSpec((1, C), lambda i: (0, 0))],
        ),
        compiler_params=pltpu.CompilerParams(dimension_semantics=("arbitrary",)),
    )(x2)

    mean = s[0] / M
    var = jnp.maximum(s2[0] / M - mean * mean, 0.0)   # clamp guards f32 cancellation
    scale = (gamma * lax.rsqrt(var + eps)).reshape(1, C).astype(jnp.float32)
    shift = (beta - mean * gamma * lax.rsqrt(var + eps)).reshape(1, C).astype(jnp.float32)

    out = pl.pallas_call(
        functools.partial(_scale_shift_relu_kernel, apply_relu=relu),
        out_shape=jax.ShapeDtypeStruct((Mp, C), jnp.float32),
        grid_spec=pltpu.PrefetchScalarGridSpec(
            num_scalar_prefetch=0,
            grid=(Mp // TR,),
            in_specs=[pl.BlockSpec((TR, C), lambda i: (i, 0)),
                      pl.BlockSpec((1, C), lambda i: (0, 0)),
                      pl.BlockSpec((1, C), lambda i: (0, 0))],
            out_specs=pl.BlockSpec((TR, C), lambda i: (i, 0)),
        ),
        compiler_params=pltpu.CompilerParams(dimension_semantics=("parallel",)),
    )(x2, scale, shift)
    return out[:M].reshape(N, H, W, C)


def maxpool_3x3_s2_p1(x):
    """MaxPool2d(kernel=3, stride=2, padding=1).

    The 9 shifted/strided window views are plain-JAX slices of the (-inf padded)
    input (total HBM footprint ~9/4 of the input, no stacked 9x buffer); a tiled
    Pallas kernel reduces them with an elementwise max.
    """
    # TODO(synk): replace the 9 materialized window views with in-kernel strided
    # (pl.ds stride=2) loads of a single padded tile to cut the remaining read amp.
    N, H, W, C = x.shape
    Ho = (H + 2 - 3) // 2 + 1
    Wo = (W + 2 - 3) // 2 + 1
    xp = jnp.pad(x, ((0, 0), (1, 1), (1, 1), (0, 0)), constant_values=-jnp.inf)

    Mo = N * Ho * Wo
    TR = min(_ROWS_TILE, _round_up(Mo, 8))
    Mp = _round_up(Mo, TR)

    taps = []
    for kh in range(3):
        for kw in range(3):
            v = xp[:, kh:kh + 2 * (Ho - 1) + 1:2, kw:kw + 2 * (Wo - 1) + 1:2, :]
            v = v.reshape(Mo, C)
            if Mp != Mo:
                v = jnp.pad(v, ((0, Mp - Mo), (0, 0)))
            taps.append(v)

    out = pl.pallas_call(
        _max_taps_kernel,
        out_shape=jax.ShapeDtypeStruct((Mp, C), x.dtype),
        grid_spec=pltpu.PrefetchScalarGridSpec(
            num_scalar_prefetch=0,
            grid=(Mp // TR,),
            in_specs=[pl.BlockSpec((TR, C), lambda i: (i, 0)) for _ in range(9)],
            out_specs=pl.BlockSpec((TR, C), lambda i: (i, 0)),
        ),
        compiler_params=pltpu.CompilerParams(dimension_semantics=("parallel",)),
    )(*taps)
    return out[:Mo].reshape(N, Ho, Wo, C)


def global_avgpool(x):
    """AdaptiveAvgPool2d((1,1)) + Flatten.  This is the smallest activation in the
    net (N x 7 x 7 x C_final at real sizes), so a single full VMEM block is fine."""
    N, H, W, C = x.shape
    x3 = x.reshape(N, H * W, C)
    return pl.pallas_call(
        _mean_hw_kernel,
        out_shape=jax.ShapeDtypeStruct((N, C), x.dtype),
        grid=(1,),
        in_specs=[pl.BlockSpec((N, H * W, C), lambda i: (0, 0, 0))],
        out_specs=pl.BlockSpec((N, C), lambda i: (0, 0)),
    )(x3)


# --------------------------------------------------------------------------------------
# Convolutions
# --------------------------------------------------------------------------------------

def _im2col(x, kh, kw, stride, pad):
    N, H, W, C = x.shape
    xp = jnp.pad(x, ((0, 0), (pad, pad), (pad, pad), (0, 0)))
    Ho = (H + 2 * pad - kh) // stride + 1
    Wo = (W + 2 * pad - kw) // stride + 1
    cols = []
    for i in range(kh):
        for j in range(kw):
            cols.append(xp[:, i:i + stride * (Ho - 1) + 1:stride,
                           j:j + stride * (Wo - 1) + 1:stride, :])
    patches = jnp.stack(cols, axis=3)                    # (N, Ho, Wo, kh*kw, C)
    return patches.reshape(N * Ho * Wo, kh * kw * C), (N, Ho, Wo)


def conv2d_nhwc(x, w_oihw, bias, *, stride, pad, apply_relu=False):
    """x: NHWC, w: PyTorch OIHW, bias: (Cout,).  ReLU optionally fused into epilogue."""
    cout, cin, kh, kw = w_oihw.shape
    if kh == 1 and kw == 1 and pad == 0:
        # 1x1 (projection) conv: no im2col at all, just a strided spatial slice.
        xs = x[:, ::stride, ::stride, :]
        N, Ho, Wo, _ = xs.shape
        cols = xs.reshape(N * Ho * Wo, cin)
        wmat = w_oihw.reshape(cout, cin).T
    else:
        # im2col only remains for the 7x7 stem conv, where K = 49*in_ch is tiny.
        cols, (N, Ho, Wo) = _im2col(x, kh, kw, stride, pad)
        wmat = jnp.transpose(w_oihw, (2, 3, 1, 0)).reshape(kh * kw * cin, cout)
    out = matmul_bias(cols, wmat, bias, apply_relu=apply_relu)
    return out.reshape(N, Ho, Wo, cout)


# --------------------------------------------------------------------------------------
# ResNet forward (faithful to the reference module's returned values)
# --------------------------------------------------------------------------------------

def residual_blk(x, p, *, maintain_channels, strides):
    # Reference: Y = bn2(conv2(relu(bn1(conv1(X))))); Y += X; return F.relu(X).
    # The Y branch never reaches the return value, so it is not computed (perf).
    if not maintain_channels:
        # X = conv3(X); return relu(X)  -> ReLU fused into the 1x1-conv matmul epilogue.
        return conv2d_nhwc(x, p["w3"], p["b3"], stride=strides, pad=0, apply_relu=True)
    # maintain_channels: return relu(X).  Here X is always a ReLU / maxpool-of-ReLU
    # output (stem ends in ReLU -> MaxPool; every block returns relu(...)), so X >= 0
    # and relu(X) == X exactly -- skip the redundant HBM pass.
    return x


def resnet_forward(x_nchw, params, arch):
    x = jnp.transpose(x_nchw, (0, 2, 3, 1)).astype(jnp.float32)    # NCHW -> NHWC
    s = params["stem"]
    x = conv2d_nhwc(x, s["w"], s["b"], stride=2, pad=3)            # Conv 7x7 s2 p3
    x = batchnorm_nhwc(x, s["gamma"], s["beta"], relu=True)        # BN + ReLU (fused)
    x = maxpool_3x3_s2_p1(x)                                       # MaxPool 3x3 s2 p1
    for si, (num_res, _ch) in enumerate(arch):
        for bi in range(num_res):
            blk = params["stages"][si][bi]
            if bi == 0 and si != 0:
                x = residual_blk(x, blk, maintain_channels=False, strides=2)
            else:
                x = residual_blk(x, blk, maintain_channels=True, strides=1)
    x = global_avgpool(x)                                          # AvgPool(1,1)+Flatten
    return matmul_bias(x, params["fc_w"].T, params["fc_b"])        # LazyLinear


# --------------------------------------------------------------------------------------
# Deterministic synthetic parameters (shapes as nn.Lazy* layers would materialize them)
# --------------------------------------------------------------------------------------

def init_params(key, in_ch, arch, num_classes):
    keys = iter(jax.random.split(key, 128))

    def conv_w(cout, cin, k):
        return 0.05 * jax.random.normal(next(keys), (cout, cin, k, k), jnp.float32)

    def vec(c, scale=0.05, base=0.0):
        return base + scale * jax.random.normal(next(keys), (c,), jnp.float32)

    params = {"stem": dict(w=conv_w(64, in_ch, 7), b=vec(64),
                           gamma=vec(64, base=1.0), beta=vec(64))}
    stages, ch_in = [], 64
    for si, (num_res, ch) in enumerate(arch):
        blocks = []
        for bi in range(num_res):
            maintain = not (bi == 0 and si != 0)
            cin = ch_in if bi == 0 else ch
            # conv1/conv2/bn1/bn2 params mirror the PyTorch module's parameter set,
            # but are never used by the forward (dead Y branch).
            blk = dict(w1=conv_w(ch, cin, 3), b1=vec(ch),
                       g1=vec(ch, base=1.0), be1=vec(ch),
                       w2=conv_w(ch, ch, 3), b2=vec(ch),
                       g2=vec(ch, base=1.0), be2=vec(ch))
            if not maintain:
                blk["w3"] = conv_w(ch, cin, 1)
                blk["b3"] = vec(ch)
            blocks.append(blk)
        stages.append(blocks)
        ch_in = ch
    params["stages"] = stages
    params["fc_w"] = 0.05 * jax.random.normal(next(keys), (num_classes, ch_in), jnp.float32)
    params["fc_b"] = 0.05 * jax.random.normal(next(keys), (num_classes,), jnp.float32)
    return params


# --------------------------------------------------------------------------------------
# Pure-JAX reference (for a self-check)
# --------------------------------------------------------------------------------------

def _ref_conv(x, w, b, stride, pad):
    wt = jnp.transpose(w, (2, 3, 1, 0))
    y = lax.conv_general_dilated(x, wt, (stride, stride), [(pad, pad), (pad, pad)],
                                 dimension_numbers=("NHWC", "HWIO", "NHWC"))
    return y + b.reshape(1, 1, 1, -1)


def _ref_bn(x, g, be, relu, eps=1e-5):
    mean = jnp.mean(x, axis=(0, 1, 2), keepdims=True)
    var = jnp.mean(jnp.square(x - mean), axis=(0, 1, 2), keepdims=True)
    y = (x - mean) / jnp.sqrt(var + eps) * g.reshape(1, 1, 1, -1) + be.reshape(1, 1, 1, -1)
    return jnp.maximum(y, 0.0) if relu else y


def _ref_forward(x_nchw, params, arch):
    x = jnp.transpose(x_nchw, (0, 2, 3, 1)).astype(jnp.float32)
    s = params["stem"]
    x = _ref_bn(_ref_conv(x, s["w"], s["b"], 2, 3), s["gamma"], s["beta"], True)
    x = lax.reduce_window(x, -jnp.inf, lax.max, (1, 3, 3, 1), (1, 2, 2, 1),
                          [(0, 0), (1, 1), (1, 1), (0, 0)])
    for si, (num_res, _ch) in enumerate(arch):
        for bi in range(num_res):
            p = params["stages"][si][bi]
            if bi == 0 and si != 0:
                x = _ref_conv(x, p["w3"], p["b3"], 2, 0)
            x = jnp.maximum(x, 0.0)        # block returns relu(X); Y path is dead
    x = jnp.mean(x, axis=(1, 2))
    return x @ params["fc_w"].T + params["fc_b"]


# --------------------------------------------------------------------------------------

if __name__ == "__main__":
    key = jax.random.PRNGKey(0)
    kx, kp = jax.random.split(key)

    arch = ((1, 64), (1, 128))            # (num_residuals, num_channels) per stage
    num_classes = 10
    x = jax.random.normal(kx, (2, 4, 16, 16), jnp.float32)   # NCHW, like PyTorch input
    params = init_params(kp, in_ch=4, arch=arch, num_classes=num_classes)

    fwd = jax.jit(lambda xx, pp: resnet_forward(xx, pp, arch))
    out = jax.block_until_ready(fwd(x, params))
    ref = jax.block_until_ready(_ref_forward(x, params, arch))

    assert out.shape == (2, num_classes)
    assert bool(jnp.all(jnp.isfinite(out)))
    np.testing.assert_allclose(np.asarray(out), np.asarray(ref), atol=5e-2, rtol=5e-2)
    print("KERNEL_OK")
</pallas_src>

<mosaic_0001>
module attributes {stable_mosaic.version = 11 : i64} {
  func.func @_bn_stats_kernel(%arg0: i32, %arg1: memref<128x64xf32, #tpu.memory_space<vmem>>, %arg2: memref<1x64xf32, #tpu.memory_space<vmem>>, %arg3: memref<1x64xf32, #tpu.memory_space<vmem>>) attributes {dimension_semantics = [#tpu.dimension_semantics<arbitrary>], iteration_bounds = array<i64: 1>, scalar_prefetch = 0 : i64, scratch_operands = 0 : i64, tpu.core_type = #tpu.core_type<tc>, window_params = [{transform_indices = @transform_0, window_bounds = array<i64: 128, 64>}, {pipeline_mode = #tpu.pipeline_mode<synchronous>, transform_indices = @transform_1, window_bounds = array<i64: 1, 64>}, {pipeline_mode = #tpu.pipeline_mode<synchronous>, transform_indices = @transform_2, window_bounds = array<i64: 1, 64>}]} {
    %c0_i32 = arith.constant 0 : i32
    %0 = arith.cmpi eq, %arg0, %c0_i32 : i32
    %1 = arith.extui %0 : i1 to i32
    %c0_i32_0 = arith.constant 0 : i32
    %2 = arith.cmpi ne, %1, %c0_i32_0 : i32
    scf.if %2 {
      %cst_11 = arith.constant 0.000000e+00 : f32
      %15 = vector.broadcast %cst_11 : f32 to vector<1x64xf32>
      %c0_12 = arith.constant 0 : index
      %c0_13 = arith.constant 0 : index
      %16 = vector.load %arg2[%c0_12, %c0_13] : memref<1x64xf32, #tpu.memory_space<vmem>>, vector<1x64xf32>
      tpu.vector_store %arg2[%c0_12, %c0_13], %15 {strides = array<i32>} : memref<1x64xf32, #tpu.memory_space<vmem>>, vector<1x64xf32>,
      %cst_14 = arith.constant 0.000000e+00 : f32
      %17 = vector.broadcast %cst_14 : f32 to vector<1x64xf32>
      %c0_15 = arith.constant 0 : index
      %c0_16 = arith.constant 0 : index
      %18 = vector.load %arg3[%c0_15, %c0_16] : memref<1x64xf32, #tpu.memory_space<vmem>>, vector<1x64xf32>
      tpu.vector_store %arg3[%c0_15, %c0_16], %17 {strides = array<i32>} : memref<1x64xf32, #tpu.memory_space<vmem>>, vector<1x64xf32>,
    } else {
    }
    %c0 = arith.constant 0 : index
    %c0_1 = arith.constant 0 : index
    %3 = vector.load %arg1[%c0, %c0_1] : memref<128x64xf32, #tpu.memory_space<vmem>>, vector<128x64xf32>
    %c0_2 = arith.constant 0 : index
    %c0_3 = arith.constant 0 : index
    %4 = vector.load %arg2[%c0_2, %c0_3] : memref<1x64xf32, #tpu.memory_space<vmem>>, vector<1x64xf32>
    %cst = arith.constant dense<0.000000e+00> : vector<64xf32>
    %5 = vector.multi_reduction <add>, %3, %cst [0] : vector<128x64xf32> to vector<64xf32>
    %6 = vector.shape_cast %5 : vector<64xf32> to vector<1x64xf32>
    %7 = arith.addf %4, %6 : vector<1x64xf32>
    %c0_4 = arith.constant 0 : index
    %c0_5 = arith.constant 0 : index
    %8 = vector.load %arg2[%c0_4, %c0_5] : memref<1x64xf32, #tpu.memory_space<vmem>>, vector<1x64xf32>
    tpu.vector_store %arg2[%c0_4, %c0_5], %7 {strides = array<i32>} : memref<1x64xf32, #tpu.memory_space<vmem>>, vector<1x64xf32>,
    %c0_6 = arith.constant 0 : index
    %c0_7 = arith.constant 0 : index
    %9 = vector.load %arg3[%c0_6, %c0_7] : memref<1x64xf32, #tpu.memory_space<vmem>>, vector<1x64xf32>
    %10 = arith.mulf %3, %3 : vector<128x64xf32>
    %cst_8 = arith.constant dense<0.000000e+00> : vector<64xf32>
    %11 = vector.multi_reduction <add>, %10, %cst_8 [0] : vector<128x64xf32> to vector<64xf32>
    %12 = vector.shape_cast %11 : vector<64xf32> to vector<1x64xf32>
    %13 = arith.addf %9, %12 : vector<1x64xf32>
    %c0_9 = arith.constant 0 : index
    %c0_10 = arith.constant 0 : index
    %14 = vector.load %arg3[%c0_9, %c0_10] : memref<1x64xf32, #tpu.memory_space<vmem>>, vector<1x64xf32>
    tpu.vector_store %arg3[%c0_9, %c0_10], %13 {strides = array<i32>} : memref<1x64xf32, #tpu.memory_space<vmem>>, vector<1x64xf32>,
    return
  }
  func.func @transform_0(%arg0: i32) -> (i32, i32) {
    %c0_i32 = arith.constant 0 : i32
    %c0_i32_0 = arith.constant 0 : i32
    return %arg0, %c0_i32 : i32, i32
  }
  func.func @transform_1(%arg0: i32) -> (i32, i32) {
    %c0_i32 = arith.constant 0 : i32
    %c0_i32_0 = arith.constant 0 : i32
    %c0_i32_1 = arith.constant 0 : i32
    return %c0_i32, %c0_i32_0 : i32, i32
  }
  func.func @transform_2(%arg0: i32) -> (i32, i32) {
    %c0_i32 = arith.constant 0 : i32
    %c0_i32_0 = arith.constant 0 : i32
    %c0_i32_1 = arith.constant 0 : i32
    return %c0_i32, %c0_i32_0 : i32, i32
  }
}

module attributes {stable_mosaic.version = 11 : i64} {
  func.func @_matmul_bias_kernel(%arg0: i32, %arg1: i32, %arg2: memref<128x256xbf16, #tpu.memory_space<vmem>>, %arg3: memref<256x128xbf16, #tpu.memory_space<vmem>>, %arg4: memref<1x128xf32, #tpu.memory_space<vmem>>, %arg5: memref<128x128xf32, #tpu.memory_space<vmem>>, %arg6: memref<128x128xf32, #tpu.memory_space<vmem>>) attributes {dimension_semantics = [#tpu.dimension_semantics<parallel>, #tpu.dimension_semantics<arbitrary>], iteration_bounds = array<i64: 1, 1>, scalar_prefetch = 0 : i64, scratch_operands = 1 : i64, tpu.core_type = #tpu.core_type<tc>, window_params = [{transform_indices = @transform_0, window_bounds = array<i64: 128, 256>}, {transform_indices = @transform_1, window_bounds = array<i64: 256, 128>}, {pipeline_mode = #tpu.pipeline_mode<synchronous>, transform_indices = @transform_2, window_bounds = array<i64: 1, 128>}, {transform_indices = @transform_3, window_bounds = array<i64: 128, 128>}]} {
    %c0_i32 = arith.constant 0 : i32
    %0 = arith.cmpi eq, %arg1, %c0_i32 : i32
    %1 = arith.extui %0 : i1 to i32
    %c0_i32_0 = arith.constant 0 : i32
    %2 = arith.cmpi ne, %1, %c0_i32_0 : i32
    scf.if %2 {
      %cst_10 = arith.constant 0.000000e+00 : f32
      %12 = vector.broadcast %cst_10 : f32 to vector<128x128xf32>
      %c0_11 = arith.constant 0 : index
      %c0_12 = arith.constant 0 : index
      %13 = vector.load %arg6[%c0_11, %c0_12] : memref<128x128xf32, #tpu.memory_space<vmem>>, vector<128x128xf32>
      tpu.vector_store %arg6[%c0_11, %c0_12], %12 {strides = array<i32>} : memref<128x128xf32, #tpu.memory_space<vmem>>, vector<128x128xf32>,
    } else {
    }
    %c0 = arith.constant 0 : index
    %c0_1 = arith.constant 0 : index
    %3 = vector.load %arg6[%c0, %c0_1] : memref<128x128xf32, #tpu.memory_space<vmem>>, vector<128x128xf32>
    %c0_2 = arith.constant 0 : index
    %c0_3 = arith.constant 0 : index
    %4 = vector.load %arg2[%c0_2, %c0_3] : memref<128x256xbf16, #tpu.memory_space<vmem>>, vector<128x256xbf16>
    %c0_4 = arith.constant 0 : index
    %c0_5 = arith.constant 0 : index
    %5 = vector.load %arg3[%c0_4, %c0_5] : memref<256x128xbf16, #tpu.memory_space<vmem>>, vector<256x128xbf16>
    %cst = arith.constant dense<0.000000e+00> : vector<128x128xf32>
    %6 = tpu.matmul %4, %5, %cst {dimension_numbers = #tpu.dot_dimension_numbers<[1], [0], [0], [1], [0, 0, 1, 1], [], []>} : vector<128x256xbf16>, vector<256x128xbf16>, vector<128x128xf32> -> vector<128x128xf32>
    %7 = arith.addf %3, %6 : vector<128x128xf32>
    %c0_6 = arith.constant 0 : index
    %c0_7 = arith.constant 0 : index
    %8 = vector.load %arg6[%c0_6, %c0_7] : memref<128x128xf32, #tpu.memory_space<vmem>>, vector<128x128xf32>
    tpu.vector_store %arg6[%c0_6, %c0_7], %7 {strides = array<i32>} : memref<128x128xf32, #tpu.memory_space<vmem>>, vector<128x128xf32>,
    %c0_i32_8 = arith.constant 0 : i32
    %9 = arith.cmpi eq, %arg1, %c0_i32_8 : i32
    %10 = arith.extui %9 : i1 to i32
    %c0_i32_9 = arith.constant 0 : i32
    %11 = arith.cmpi ne, %10, %c0_i32_9 : i32
    scf.if %11 {
      %c0_10 = arith.constant 0 : index
      %c0_11 = arith.constant 0 : index
      %12 = vector.load %arg6[%c0_10, %c0_11] : memref<128x128xf32, #tpu.memory_space<vmem>>, vector<128x128xf32>
      %c0_12 = arith.constant 0 : index
      %c0_13 = arith.constant 0 : index
      %13 = vector.load %arg4[%c0_12, %c0_13] : memref<1x128xf32, #tpu.memory_space<vmem>>, vector<1x128xf32>
      %14 = vector.broadcast %13 : vector<1x128xf32> to vector<128x128xf32>
      %15 = arith.addf %12, %14 : vector<128x128xf32>
      %c0_14 = arith.constant 0 : index
      %c0_15 = arith.constant 0 : index
      %16 = vector.load %arg5[%c0_14, %c0_15] : memref<128x128xf32, #tpu.memory_space<vmem>>, vector<128x128xf32>
      tpu.vector_store %arg5[%c0_14, %c0_15], %15 {strides = array<i32>} : memref<128x128xf32, #tpu.memory_space<vmem>>, vector<128x128xf32>,
    } else {
    }
    return
  }
  func.func @transform_0(%arg0: i32, %arg1: i32) -> (i32, i32) {
    %c0_i32 = arith.constant 0 : i32
    return %arg0, %arg1 : i32, i32
  }
  func.func @transform_1(%arg0: i32, %arg1: i32) -> (i32, i32) {
    %c0_i32 = arith.constant 0 : i32
    %c0_i32_0 = arith.constant 0 : i32
    return %arg1, %c0_i32 : i32, i32
  }
  func.func @transform_2(%arg0: i32, %arg1: i32) -> (i32, i32) {
    %c0_i32 = arith.constant 0 : i32
    %c0_i32_0 = arith.constant 0 : i32
    %c0_i32_1 = arith.constant 0 : i32
    return %c0_i32, %c0_i32_0 : i32, i32
  }
  func.func @transform_3(%arg0: i32, %arg1: i32) -> (i32, i32) {
    %c0_i32 = arith.constant 0 : i32
    %c0_i32_0 = arith.constant 0 : i32
    return %arg0, %c0_i32 : i32, i32
  }
}

module attributes {stable_mosaic.version = 11 : i64} {
  func.func @_scale_shift_relu_kernel(%arg0: i32, %arg1: memref<128x64xf32, #tpu.memory_space<vmem>>, %arg2: memref<1x64xf32, #tpu.memory_space<vmem>>, %arg3: memref<1x64xf32, #tpu.memory_space<vmem>>, %arg4: memref<128x64xf32, #tpu.memory_space<vmem>>) attributes {dimension_semantics = [#tpu.dimension_semantics<parallel>], iteration_bounds = array<i64: 1>, scalar_prefetch = 0 : i64, scratch_operands = 0 : i64, tpu.core_type = #tpu.core_type<tc>, window_params = [{transform_indices = @transform_0, window_bounds = array<i64: 128, 64>}, {pipeline_mode = #tpu.pipeline_mode<synchronous>, transform_indices = @transform_1, window_bounds = array<i64: 1, 64>}, {pipeline_mode = #tpu.pipeline_mode<synchronous>, transform_indices = @transform_2, window_bounds = array<i64: 1, 64>}, {transform_indices = @transform_3, window_bounds = array<i64: 128, 64>}]} {
    %c0 = arith.constant 0 : index
    %c0_0 = arith.constant 0 : index
    %0 = vector.load %arg1[%c0, %c0_0] : memref<128x64xf32, #tpu.memory_space<vmem>>, vector<128x64xf32>
    %c0_1 = arith.constant 0 : index
    %c0_2 = arith.constant 0 : index
    %1 = vector.load %arg2[%c0_1, %c0_2] : memref<1x64xf32, #tpu.memory_space<vmem>>, vector<1x64xf32>
    %2 = vector.broadcast %1 : vector<1x64xf32> to vector<128x64xf32>
    %3 = arith.mulf %0, %2 : vector<128x64xf32>
    %c0_3 = arith.constant 0 : index
    %c0_4 = arith.constant 0 : index
    %4 = vector.load %arg3[%c0_3, %c0_4] : memref<1x64xf32, #tpu.memory_space<vmem>>, vector<1x64xf32>
    %5 = vector.broadcast %4 : vector<1x64xf32> to vector<128x64xf32>
    %6 = arith.addf %3, %5 : vector<128x64xf32>
    %cst = arith.constant 0.000000e+00 : f32
    %7 = vector.broadcast %cst : f32 to vector<128x64xf32>
    %8 = arith.maximumf %6, %7 : vector<128x64xf32>
    %c0_5 = arith.constant 0 : index
    %c0_6 = arith.constant 0 : index
    %9 = vector.load %arg4[%c0_5, %c0_6] : memref<128x64xf32, #tpu.memory_space<vmem>>, vector<128x64xf32>
    tpu.vector_store %arg4[%c0_5, %c0_6], %8 {strides = array<i32>} : memref<128x64xf32, #tpu.memory_space<vmem>>, vector<128x64xf32>,
    return
  }
  func.func @transform_0(%arg0: i32) -> (i32, i32) {
    %c0_i32 = arith.constant 0 : i32
    %c0_i32_0 = arith.constant 0 : i32
    return %arg0, %c0_i32 : i32, i32
  }
  func.func @transform_1(%arg0: i32) -> (i32, i32) {
    %c0_i32 = arith.constant 0 : i32
    %c0_i32_0 = arith.constant 0 : i32
    %c0_i32_1 = arith.constant 0 : i32
    return %c0_i32, %c0_i32_0 : i32, i32
  }
  func.func @transform_2(%arg0: i32) -> (i32, i32) {
    %c0_i32 = arith.constant 0 : i32
    %c0_i32_0 = arith.constant 0 : i32
    %c0_i32_1 = arith.constant 0 : i32
    return %c0_i32, %c0_i32_0 : i32, i32
  }
  func.func @transform_3(%arg0: i32) -> (i32, i32) {
    %c0_i32 = arith.constant 0 : i32
    %c0_i32_0 = arith.constant 0 : i32
    return %arg0, %c0_i32 : i32, i32
  }
}

module attributes {stable_mosaic.version = 11 : i64} {
  func.func @_max_taps_kernel(%arg0: i32, %arg1: memref<32x64xf32, #tpu.memory_space<vmem>>, %arg2: memref<32x64xf32, #tpu.memory_space<vmem>>, %arg3: memref<32x64xf32, #tpu.memory_space<vmem>>, %arg4: memref<32x64xf32, #tpu.memory_space<vmem>>, %arg5: memref<32x64xf32, #tpu.memory_space<vmem>>, %arg6: memref<32x64xf32, #tpu.memory_space<vmem>>, %arg7: memref<32x64xf32, #tpu.memory_space<vmem>>, %arg8: memref<32x64xf32, #tpu.memory_space<vmem>>, %arg9: memref<32x64xf32, #tpu.memory_space<vmem>>, %arg10: memref<32x64xf32, #tpu.memory_space<vmem>>) attributes {dimension_semantics = [#tpu.dimension_semantics<parallel>], iteration_bounds = array<i64: 1>, scalar_prefetch = 0 : i64, scratch_operands = 0 : i64, tpu.core_type = #tpu.core_type<tc>, window_params = [{transform_indices = @transform_0, window_bounds = array<i64: 32, 64>}, {transform_indices = @transform_1, window_bounds = array<i64: 32, 64>}, {transform_indices = @transform_2, window_bounds = array<i64: 32, 64>}, {transform_indices = @transform_3, window_bounds = array<i64: 32, 64>}, {transform_indices = @transform_4, window_bounds = array<i64: 32, 64>}, {transform_indices = @transform_5, window_bounds = array<i64: 32, 64>}, {transform_indices = @transform_6, window_bounds = array<i64: 32, 64>}, {transform_indices = @transform_7, window_bounds = array<i64: 32, 64>}, {transform_indices = @transform_8, window_bounds = array<i64: 32, 64>}, {transform_indices = @transform_9, window_bounds = array<i64: 32, 64>}]} {
    %c0 = arith.constant 0 : index
    %c0_0 = arith.constant 0 : index
    %0 = vector.load %arg1[%c0, %c0_0] : memref<32x64xf32, #tpu.memory_space<vmem>>, vector<32x64xf32>
    %c0_1 = arith.constant 0 : index
    %c0_2 = arith.constant 0 : index
    %1 = vector.load %arg2[%c0_1, %c0_2] : memref<32x64xf32, #tpu.memory_space<vmem>>, vector<32x64xf32>
    %2 = arith.maximumf %0, %1 : vector<32x64xf32>
    %c0_3 = arith.constant 0 : index
    %c0_4 = arith.constant 0 : index
    %3 = vector.load %arg3[%c0_3, %c0_4] : memref<32x64xf32, #tpu.memory_space<vmem>>, vector<32x64xf32>
    %4 = arith.maximumf %2, %3 : vector<32x64xf32>
    %c0_5 = arith.constant 0 : index
    %c0_6 = arith.constant 0 : index
    %5 = vector.load %arg4[%c0_5, %c0_6] : memref<32x64xf32, #tpu.memory_space<vmem>>, vector<32x64xf32>
    %6 = arith.maximumf %4, %5 : vector<32x64xf32>
    %c0_7 = arith.constant 0 : index
    %c0_8 = arith.constant 0 : index
    %7 = vector.load %arg5[%c0_7, %c0_8] : memref<32x64xf32, #tpu.memory_space<vmem>>, vector<32x64xf32>
    %8 = arith.maximumf %6, %7 : vector<32x64xf32>
    %c0_9 = arith.constant 0 : index
    %c0_10 = arith.constant 0 : index
    %9 = vector.load %arg6[%c0_9, %c0_10] : memref<32x64xf32, #tpu.memory_space<vmem>>, vector<32x64xf32>
    %10 = arith.maximumf %8, %9 : vector<32x64xf32>
    %c0_11 = arith.constant 0 : index
    %c0_12 = arith.constant 0 : index
    %11 = vector.load %arg7[%c0_11, %c0_12] : memref<32x64xf32, #tpu.memory_space<vmem>>, vector<32x64xf32>
    %12 = arith.maximumf %10, %11 : vector<32x64xf32>
    %c0_13 = arith.constant 0 : index
    %c0_14 = arith.constant 0 : index
    %13 = vector.load %arg8[%c0_13, %c0_14] : memref<32x64xf32, #tpu.memory_space<vmem>>, vector<32x64xf32>
    %14 = arith.maximumf %12, %13 : vector<32x64xf32>
    %c0_15 = arith.constant 0 : index
    %c0_16 = arith.constant 0 : index
    %15 = vector.load %arg9[%c0_15, %c0_16] : memref<32x64xf32, #tpu.memory_space<vmem>>, vector<32x64xf32>
    %16 = arith.maximumf %14, %15 : vector<32x64xf32>
    %c0_17 = arith.constant 0 : index
    %c0_18 = arith.constant 0 : index
    %17 = vector.load %arg10[%c0_17, %c0_18] : memref<32x64xf32, #tpu.memory_space<vmem>>, vector<32x64xf32>
    tpu.vector_store %arg10[%c0_17, %c0_18], %16 {strides = array<i32>} : memref<32x64xf32, #tpu.memory_space<vmem>>, vector<32x64xf32>,
    return
  }
  func.func @transform_0(%arg0: i32) -> (i32, i32) {
    %c0_i32 = arith.constant 0 : i32
    %c0_i32_0 = arith.constant 0 : i32
    return %arg0, %c0_i32 : i32, i32
  }
  func.func @transform_1(%arg0: i32) -> (i32, i32) {
    %c0_i32 = arith.constant 0 : i32
    %c0_i32_0 = arith.constant 0 : i32
    return %arg0, %c0_i32 : i32, i32
  }
  func.func @transform_2(%arg0: i32) -> (i32, i32) {
    %c0_i32 = arith.constant 0 : i32
    %c0_i32_0 = arith.constant 0 : i32
    return %arg0, %c0_i32 : i32, i32
  }
  func.func @transform_3(%arg0: i32) -> (i32, i32) {
    %c0_i32 = arith.constant 0 : i32
    %c0_i32_0 = arith.constant 0 : i32
    return %arg0, %c0_i32 : i32, i32
  }
  func.func @transform_4(%arg0: i32) -> (i32, i32) {
    %c0_i32 = arith.constant 0 : i32
    %c0_i32_0 = arith.constant 0 : i32
    return %arg0, %c0_i32 : i32, i32
  }
  func.func @transform_5(%arg0: i32) -> (i32, i32) {
    %c0_i32 = arith.constant 0 : i32
    %c0_i32_0 = arith.constant 0 : i32
    return %arg0, %c0_i32 : i32, i32
  }
  func.func @transform_6(%arg0: i32) -> (i32, i32) {
    %c0_i32 = arith.constant 0 : i32
    %c0_i32_0 = arith.constant 0 : i32
    return %arg0, %c0_i32 : i32, i32
  }
  func.func @transform_7(%arg0: i32) -> (i32, i32) {
    %c0_i32 = arith.constant 0 : i32
    %c0_i32_0 = arith.constant 0 : i32
    return %arg0, %c0_i32 : i32, i32
  }
  func.func @transform_8(%arg0: i32) -> (i32, i32) {
    %c0_i32 = arith.constant 0 : i32
    %c0_i32_0 = arith.constant 0 : i32
    return %arg0, %c0_i32 : i32, i32
  }
  func.func @transform_9(%arg0: i32) -> (i32, i32) {
    %c0_i32 = arith.constant 0 : i32
    %c0_i32_0 = arith.constant 0 : i32
    return %arg0, %c0_i32 : i32, i32
  }
}

module attributes {stable_mosaic.version = 11 : i64} {
  func.func @_matmul_bias_kernel(%arg0: i32, %arg1: i32, %arg2: memref<16x128xbf16, #tpu.memory_space<vmem>>, %arg3: memref<128x128xbf16, #tpu.memory_space<vmem>>, %arg4: memref<1x128xf32, #tpu.memory_space<vmem>>, %arg5: memref<16x128xf32, #tpu.memory_space<vmem>>, %arg6: memref<16x128xf32, #tpu.memory_space<vmem>>) attributes {dimension_semantics = [#tpu.dimension_semantics<parallel>, #tpu.dimension_semantics<arbitrary>], iteration_bounds = array<i64: 1, 1>, scalar_prefetch = 0 : i64, scratch_operands = 1 : i64, tpu.core_type = #tpu.core_type<tc>, window_params = [{transform_indices = @transform_0, window_bounds = array<i64: 16, 128>}, {transform_indices = @transform_1, window_bounds = array<i64: 128, 128>}, {pipeline_mode = #tpu.pipeline_mode<synchronous>, transform_indices = @transform_2, window_bounds = array<i64: 1, 128>}, {transform_indices = @transform_3, window_bounds = array<i64: 16, 128>}]} {
    %c0_i32 = arith.constant 0 : i32
    %0 = arith.cmpi eq, %arg1, %c0_i32 : i32
    %1 = arith.extui %0 : i1 to i32
    %c0_i32_0 = arith.constant 0 : i32
    %2 = arith.cmpi ne, %1, %c0_i32_0 : i32
    scf.if %2 {
      %cst_10 = arith.constant 0.000000e+00 : f32
      %12 = vector.broadcast %cst_10 : f32 to vector<16x128xf32>
      %c0_11 = arith.constant 0 : index
      %c0_12 = arith.constant 0 : index
      %13 = vector.load %arg6[%c0_11, %c0_12] : memref<16x128xf32, #tpu.memory_space<vmem>>, vector<16x128xf32>
      tpu.vector_store %arg6[%c0_11, %c0_12], %12 {strides = array<i32>} : memref<16x128xf32, #tpu.memory_space<vmem>>, vector<16x128xf32>,
    } else {
    }
    %c0 = arith.constant 0 : index
    %c0_1 = arith.constant 0 : index
    %3 = vector.load %arg6[%c0, %c0_1] : memref<16x128xf32, #tpu.memory_space<vmem>>, vector<16x128xf32>
    %c0_2 = arith.constant 0 : index
    %c0_3 = arith.constant 0 : index
    %4 = vector.load %arg2[%c0_2, %c0_3] : memref<16x128xbf16, #tpu.memory_space<vmem>>, vector<16x128xbf16>
    %c0_4 = arith.constant 0 : index
    %c0_5 = arith.constant 0 : index
    %5 = vector.load %arg3[%c0_4, %c0_5] : memref<128x128xbf16, #tpu.memory_space<vmem>>, vector<128x128xbf16>
    %cst = arith.constant dense<0.000000e+00> : vector<16x128xf32>
    %6 = tpu.matmul %4, %5, %cst {dimension_numbers = #tpu.dot_dimension_numbers<[1], [0], [0], [1], [0, 0, 1, 1], [], []>} : vector<16x128xbf16>, vector<128x128xbf16>, vector<16x128xf32> -> vector<16x128xf32>
    %7 = arith.addf %3, %6 : vector<16x128xf32>
    %c0_6 = arith.constant 0 : index
    %c0_7 = arith.constant 0 : index
    %8 = vector.load %arg6[%c0_6, %c0_7] : memref<16x128xf32, #tpu.memory_space<vmem>>, vector<16x128xf32>
    tpu.vector_store %arg6[%c0_6, %c0_7], %7 {strides = array<i32>} : memref<16x128xf32, #tpu.memory_space<vmem>>, vector<16x128xf32>,
    %c0_i32_8 = arith.constant 0 : i32
    %9 = arith.cmpi eq, %arg1, %c0_i32_8 : i32
    %10 = arith.extui %9 : i1 to i32
    %c0_i32_9 = arith.constant 0 : i32
    %11 = arith.cmpi ne, %10, %c0_i32_9 : i32
    scf.if %11 {
      %c0_10 = arith.constant 0 : index
      %c0_11 = arith.constant 0 : index
      %12 = vector.load %arg6[%c0_10, %c0_11] : memref<16x128xf32, #tpu.memory_space<vmem>>, vector<16x128xf32>
      %c0_12 = arith.constant 0 : index
      %c0_13 = arith.constant 0 : index
      %13 = vector.load %arg4[%c0_12, %c0_13] : memref<1x128xf32, #tpu.memory_space<vmem>>, vector<1x128xf32>
      %14 = vector.broadcast %13 : vector<1x128xf32> to vector<16x128xf32>
      %15 = arith.addf %12, %14 : vector<16x128xf32>
      %cst_14 = arith.constant 0.000000e+00 : f32
      %16 = vector.broadcast %cst_14 : f32 to vector<16x128xf32>
      %17 = arith.maximumf %15, %16 : vector<16x128xf32>
      %c0_15 = arith.constant 0 : index
      %c0_16 = arith.constant 0 : index
      %18 = vector.load %arg5[%c0_15, %c0_16] : memref<16x128xf32, #tpu.memory_space<vmem>>, vector<16x128xf32>
      tpu.vector_store %arg5[%c0_15, %c0_16], %17 {strides = array<i32>} : memref<16x128xf32, #tpu.memory_space<vmem>>, vector<16x128xf32>,
    } else {
    }
    return
  }
  func.func @transform_0(%arg0: i32, %arg1: i32) -> (i32, i32) {
    %c0_i32 = arith.constant 0 : i32
    return %arg0, %arg1 : i32, i32
  }
  func.func @transform_1(%arg0: i32, %arg1: i32) -> (i32, i32) {
    %c0_i32 = arith.constant 0 : i32
    %c0_i32_0 = arith.constant 0 : i32
    return %arg1, %c0_i32 : i32, i32
  }
  func.func @transform_2(%arg0: i32, %arg1: i32) -> (i32, i32) {
    %c0_i32 = arith.constant 0 : i32
    %c0_i32_0 = arith.constant 0 : i32
    %c0_i32_1 = arith.constant 0 : i32
    return %c0_i32, %c0_i32_0 : i32, i32
  }
  func.func @transform_3(%arg0: i32, %arg1: i32) -> (i32, i32) {
    %c0_i32 = arith.constant 0 : i32
    %c0_i32_0 = arith.constant 0 : i32
    return %arg0, %c0_i32 : i32, i32
  }
}

module attributes {stable_mosaic.version = 11 : i64} {
  func.func @_mean_hw_kernel(%arg0: i32, %arg1: memref<2x4x128xf32, #tpu.memory_space<vmem>>, %arg2: memref<2x128xf32, #tpu.memory_space<vmem>>) attributes {dimension_semantics = [#tpu.dimension_semantics<arbitrary>], iteration_bounds = array<i64: 1>, scalar_prefetch = 0 : i64, scratch_operands = 0 : i64, tpu.core_type = #tpu.core_type<tc>, window_params = [{pipeline_mode = #tpu.pipeline_mode<synchronous>, transform_indices = @transform_0, window_bounds = array<i64: 2, 4, 128>}, {pipeline_mode = #tpu.pipeline_mode<synchronous>, transform_indices = @transform_1, window_bounds = array<i64: 2, 128>}]} {
    %c0 = arith.constant 0 : index
    %c0_0 = arith.constant 0 : index
    %c0_1 = arith.constant 0 : index
    %0 = vector.load %arg1[%c0, %c0_0, %c0_1] : memref<2x4x128xf32, #tpu.memory_space<vmem>>, vector<2x4x128xf32>
    %cst = arith.constant dense<0.000000e+00> : vector<2x128xf32>
    %1 = vector.multi_reduction <add>, %0, %cst [1] : vector<2x4x128xf32> to vector<2x128xf32>
    %cst_2 = arith.constant 4.000000e+00 : f32
    %2 = vector.broadcast %cst_2 : f32 to vector<2x128xf32>
    %3 = arith.divf %1, %2 : vector<2x128xf32>
    %c0_3 = arith.constant 0 : index
    %c0_4 = arith.constant 0 : index
    %4 = vector.load %arg2[%c0_3, %c0_4] : memref<2x128xf32, #tpu.memory_space<vmem>>, vector<2x128xf32>
    tpu.vector_store %arg2[%c0_3, %c0_4], %3 {strides = array<i32>} : memref<2x128xf32, #tpu.memory_space<vmem>>, vector<2x128xf32>,
    return
  }
  func.func @transform_0(%arg0: i32) -> (i32, i32, i32) {
    %c0_i32 = arith.constant 0 : i32
    %c0_i32_0 = arith.constant 0 : i32
    %c0_i32_1 = arith.constant 0 : i32
    %c0_i32_2 = arith.constant 0 : i32
    return %c0_i32, %c0_i32_0, %c0_i32_1 : i32, i32, i32
  }
  func.func @transform_1(%arg0: i32) -> (i32, i32) {
    %c0_i32 = arith.constant 0 : i32
    %c0_i32_0 = arith.constant 0 : i32
    %c0_i32_1 = arith.constant 0 : i32
    return %c0_i32, %c0_i32_0 : i32, i32
  }
}

module attributes {stable_mosaic.version = 11 : i64} {
  func.func @_matmul_bias_kernel(%arg0: i32, %arg1: i32, %arg2: memref<16x128xbf16, #tpu.memory_space<vmem>>, %arg3: memref<128x128xbf16, #tpu.memory_space<vmem>>, %arg4: memref<1x128xf32, #tpu.memory_space<vmem>>, %arg5: memref<16x128xf32, #tpu.memory_space<vmem>>, %arg6: memref<16x128xf32, #tpu.memory_space<vmem>>) attributes {dimension_semantics = [#tpu.dimension_semantics<parallel>, #tpu.dimension_semantics<arbitrary>], iteration_bounds = array<i64: 1, 1>, scalar_prefetch = 0 : i64, scratch_operands = 1 : i64, tpu.core_type = #tpu.core_type<tc>, window_params = [{transform_indices = @transform_0, window_bounds = array<i64: 16, 128>}, {transform_indices = @transform_1, window_bounds = array<i64: 128, 128>}, {pipeline_mode = #tpu.pipeline_mode<synchronous>, transform_indices = @transform_2, window_bounds = array<i64: 1, 128>}, {transform_indices = @transform_3, window_bounds = array<i64: 16, 128>}]} {
    %c0_i32 = arith.constant 0 : i32
    %0 = arith.cmpi eq, %arg1, %c0_i32 : i32
    %1 = arith.extui %0 : i1 to i32
    %c0_i32_0 = arith.constant 0 : i32
    %2 = arith.cmpi ne, %1, %c0_i32_0 : i32
    scf.if %2 {
      %cst_10 = arith.constant 0.000000e+00 : f32
      %12 = vector.broadcast %cst_10 : f32 to vector<16x128xf32>
      %c0_11 = arith.constant 0 : index
      %c0_12 = arith.constant 0 : index
      %13 = vector.load %arg6[%c0_11, %c0_12] : memref<16x128xf32, #tpu.memory_space<vmem>>, vector<16x128xf32>
      tpu.vector_store %arg6[%c0_11, %c0_12], %12 {strides = array<i32>} : memref<16x128xf32, #tpu.memory_space<vmem>>, vector<16x128xf32>,
    } else {
    }
    %c0 = arith.constant 0 : index
    %c0_1 = arith.constant 0 : index
    %3 = vector.load %arg6[%c0, %c0_1] : memref<16x128xf32, #tpu.memory_space<vmem>>, vector<16x128xf32>
    %c0_2 = arith.constant 0 : index
    %c0_3 = arith.constant 0 : index
    %4 = vector.load %arg2[%c0_2, %c0_3] : memref<16x128xbf16, #tpu.memory_space<vmem>>, vector<16x128xbf16>
    %c0_4 = arith.constant 0 : index
    %c0_5 = arith.constant 0 : index
    %5 = vector.load %arg3[%c0_4, %c0_5] : memref<128x128xbf16, #tpu.memory_space<vmem>>, vector<128x128xbf16>
    %cst = arith.constant dense<0.000000e+00> : vector<16x128xf32>
    %6 = tpu.matmul %4, %5, %cst {dimension_numbers = #tpu.dot_dimension_numbers<[1], [0], [0], [1], [0, 0, 1, 1], [], []>} : vector<16x128xbf16>, vector<128x128xbf16>, vector<16x128xf32> -> vector<16x128xf32>
    %7 = arith.addf %3, %6 : vector<16x128xf32>
    %c0_6 = arith.constant 0 : index
    %c0_7 = arith.constant 0 : index
    %8 = vector.load %arg6[%c0_6, %c0_7] : memref<16x128xf32, #tpu.memory_space<vmem>>, vector<16x128xf32>
    tpu.vector_store %arg6[%c0_6, %c0_7], %7 {strides = array<i32>} : memref<16x128xf32, #tpu.memory_space<vmem>>, vector<16x128xf32>,
    %c0_i32_8 = arith.constant 0 : i32
    %9 = arith.cmpi eq, %arg1, %c0_i32_8 : i32
    %10 = arith.extui %9 : i1 to i32
    %c0_i32_9 = arith.constant 0 : i32
    %11 = arith.cmpi ne, %10, %c0_i32_9 : i32
    scf.if %11 {
      %c0_10 = arith.constant 0 : index
      %c0_11 = arith.constant 0 : index
      %12 = vector.load %arg6[%c0_10, %c0_11] : memref<16x128xf32, #tpu.memory_space<vmem>>, vector<16x128xf32>
      %c0_12 = arith.constant 0 : index
      %c0_13 = arith.constant 0 : index
      %13 = vector.load %arg4[%c0_12, %c0_13] : memref<1x128xf32, #tpu.memory_space<vmem>>, vector<1x128xf32>
      %14 = vector.broadcast %13 : vector<1x128xf32> to vector<16x128xf32>
      %15 = arith.addf %12, %14 : vector<16x128xf32>
      %c0_14 = arith.constant 0 : index
      %c0_15 = arith.constant 0 : index
      %16 = vector.load %arg5[%c0_14, %c0_15] : memref<16x128xf32, #tpu.memory_space<vmem>>, vector<16x128xf32>
      tpu.vector_store %arg5[%c0_14, %c0_15], %15 {strides = array<i32>} : memref<16x128xf32, #tpu.memory_space<vmem>>, vector<16x128xf32>,
    } else {
    }
    return
  }
  func.func @transform_0(%arg0: i32, %arg1: i32) -> (i32, i32) {
    %c0_i32 = arith.constant 0 : i32
    return %arg0, %arg1 : i32, i32
  }
  func.func @transform_1(%arg0: i32, %arg1: i32) -> (i32, i32) {
    %c0_i32 = arith.constant 0 : i32
    %c0_i32_0 = arith.constant 0 : i32
    return %arg1, %c0_i32 : i32, i32
  }
  func.func @transform_2(%arg0: i32, %arg1: i32) -> (i32, i32) {
    %c0_i32 = arith.constant 0 : i32
    %c0_i32_0 = arith.constant 0 : i32
    %c0_i32_1 = arith.constant 0 : i32
    return %c0_i32, %c0_i32_0 : i32, i32
  }
  func.func @transform_3(%arg0: i32, %arg1: i32) -> (i32, i32) {
    %c0_i32 = arith.constant 0 : i32
    %c0_i32_0 = arith.constant 0 : i32
    return %arg0, %c0_i32 : i32, i32
  }
}

</mosaic_0001>

<bundles_post_ra>
// kernel: _lambda_.8
= control target key start
LH: loop header
LB: loop body
LE: loop exit
PB: predicated region body
PF: predicated region fallthrough
CT: control target
= control target key end

     0   :  { %vm14_vm0 = vcmask 516096   ;;  %vm34_vm1 = vcmask 523264   ;;  %v140_v0 = vmov 0.0   ;;  %s258_s0 = inlined_call_operand.vmem [shape: f32[128,64], index: 0, kind: input, shape index: {}]   ;;  %s259_s1 = inlined_call_operand.vmem [shape: f32[1,64], index: 1, kind: output, shape index: {0}]   ;;  %s260_s2 = inlined_call_operand.vmem [shape: f32[1,64], index: 2, kind: output, shape index: {1}]  }
   0x1   :  { %15 = vst.msk [vmem:[%s259_s1] sm:$0x1] %vm14_vm0, %v140_v0  ;;  %v17_v1 = vld [vmem:[%s258_s0] sm:$0xff]  ;;  %v18_v2 = vld [vmem:[%s258_s0 + $0x8] sm:$0xff]  ;;  %v19_v3 = vld [vmem:[%s258_s0 + $0x10] sm:$0xff] }
   0x2   :  { %v35_v4 = vsel %vm34_vm1, %v17_v1, 0.0  ;;  %v36_v5 = vsel %vm34_vm1, %v18_v2, 0.0  ;;  %v38_v6 = vsel %vm34_vm1, %v19_v3, 0.0  ;;  %v20_v7 = vld [vmem:[%s258_s0 + $0x18] sm:$0xff]  ;;  %v21_v10 = vld [vmem:[%s258_s0 + $0x20] sm:$0xff]  ;;  %v22_v13 = vld [vmem:[%s258_s0 + $0x28] sm:$0xff]  ;;  %v76_v15 = vmul.f32 %v17_v1, %v17_v1 }
   0x3   :  { %v37_v8 = vadd.f32 %v36_v5, %v35_v4  ;;  %v40_v9 = vsel %vm34_vm1, %v20_v7, 0.0  ;;  %v42_v12 = vsel %vm34_vm1, %v21_v10, 0.0  ;;  %16 = vst.msk [vmem:[%s260_s2] sm:$0x1] %vm14_vm0, %v140_v0  ;;  %v77_v16 = vmul.f32 %v18_v2, %v18_v2  ;;  %v23_v19 = vld [vmem:[%s258_s0 + $0x30] sm:$0xff]  ;;  %v24_v24 = vld [vmem:[%s258_s0 + $0x38] sm:$0xff] }
   0x4   :  { %v78_v17 = vmul.f32 %v19_v3, %v19_v3  ;;  %v44_v18 = vsel %vm34_vm1, %v22_v13, 0.0  ;;  %v79_v21 = vmul.f32 %v20_v7, %v20_v7  ;;  %v46_v22 = vsel %vm34_vm1, %v23_v19, 0.0  ;;  %v25_v31 = vld [vmem:[%s258_s0 + $0x40] sm:$0xff]  ;;  %v26_v37 = vld [vmem:[%s258_s0 + $0x48] sm:$0xff]  ;;  %v27_v43 = vld [vmem:[%s258_s0 + $0x50] sm:$0xff] }
   0x5   :  { %v39_v11 = vadd.f32 %v38_v6, %v37_v8  ;;  %v80_v23 = vmul.f32 %v21_v10, %v21_v10  ;;  %v92_v26 = vsel %vm34_vm1, %v76_v15, 0.0  ;;  %v93_v27 = vsel %vm34_vm1, %v77_v16, 0.0  ;;  %v28_v49 = vld [vmem:[%s258_s0 + $0x58] sm:$0xff]  ;;  %v29_v55 = vld [vmem:[%s258_s0 + $0x60] sm:$0xff]  ;;  %v30_v61 = vld [vmem:[%s258_s0 + $0x68] sm:$0xff] }
   0x6   :  { %v95_v28 = vsel %vm34_vm1, %v78_v17, 0.0  ;;  %v48_v29 = vsel %vm34_vm1, %v24_v24, 0.0  ;;  %v94_v30 = vadd.f32 %v93_v27, %v92_v26  ;;  %v81_v33 = vmul.f32 %v22_v13, %v22_v13  ;;  %v31_v3 = vld [vmem:[%s258_s0 + $0x70] sm:$0xff] }
   0x7   :  { %v41_v14 = vadd.f32 %v40_v9, %v39_v11  ;;  %v97_v34 = vsel %vm34_vm1, %v79_v21, 0.0  ;;  %v50_v35 = vsel %vm34_vm1, %v25_v31, 0.0  ;;  %v82_v39 = vmul.f32 %v23_v19, %v23_v19  ;;  %v32_v9 = vld [vmem:[%s258_s0 + $0x78] sm:$0xff] }
   0x8   :  { %v96_v36 = vadd.f32 %v95_v28, %v94_v30  ;;  %v99_v40 = vsel %vm34_vm1, %v80_v23, 0.0  ;;  %v52_v41 = vsel %vm34_vm1, %v26_v37, 0.0  ;;  %v83_v45 = vmul.f32 %v24_v24, %v24_v24 }
   0x9   :  { %v43_v20 = vadd.f32 %v42_v12, %v41_v14  ;;  %v101_v46 = vsel %vm34_vm1, %v81_v33, 0.0  ;;  %v54_v47 = vsel %vm34_vm1, %v27_v43, 0.0  ;;  %v84_v51 = vmul.f32 %v25_v31, %v25_v31 }
   0xa   :  { %v98_v42 = vadd.f32 %v97_v34, %v96_v36  ;;  %v103_v52 = vsel %vm34_vm1, %v82_v39, 0.0  ;;  %v56_v53 = vsel %vm34_vm1, %v28_v49, 0.0  ;;  %v85_v57 = vmul.f32 %v26_v37, %v26_v37  ;;  %v33_v36 = vld [vmem:[%s259_s1] sm:$0x1] }
   0xb   :  { %v45_v25 = vadd.f32 %v44_v18, %v43_v20  ;;  %v105_v58 = vsel %vm34_vm1, %v83_v45, 0.0  ;;  %v58_v59 = vsel %vm34_vm1, %v29_v55, 0.0  ;;  %v86_v63 = vmul.f32 %v27_v43, %v27_v43 }
   0xc   :  { %v100_v48 = vadd.f32 %v99_v40, %v98_v42  ;;  %v107_v0 = vsel %vm34_vm1, %v84_v51, 0.0  ;;  %v60_v1 = vsel %vm34_vm1, %v30_v61, 0.0  ;;  %v87_v5 = vmul.f32 %v28_v49, %v28_v49 }
   0xd   :  { %v47_v32 = vadd.f32 %v46_v22, %v45_v25  ;;  %v109_v6 = vsel %vm34_vm1, %v85_v57, 0.0  ;;  %v62_v7 = vsel %vm34_vm1, %v31_v3, 0.0  ;;  %v88_v11 = vmul.f32 %v29_v55, %v29_v55 }
   0xe   :  { %v102_v54 = vadd.f32 %v101_v46, %v100_v48  ;;  %v111_v12 = vsel %vm34_vm1, %v86_v63, 0.0  ;;  %v64_v13 = vsel %vm34_vm1, %v32_v9, 0.0  ;;  %v89_v16 = vmul.f32 %v30_v61, %v30_v61 }
   0xf   :  { %v49_v38 = vadd.f32 %v48_v29, %v47_v32  ;;  %v113_v17 = vsel %vm34_vm1, %v87_v5, 0.0  ;;  %v90_v20 = vmul.f32 %v31_v3, %v31_v3  ;;  %v115_v21 = vsel %vm34_vm1, %v88_v11, 0.0 }
  0x10   :  { %v104_v60 = vadd.f32 %v103_v52, %v102_v54  ;;  %v91_v24 = vmul.f32 %v32_v9, %v32_v9  ;;  %v117_v25 = vsel %vm34_vm1, %v89_v16, 0.0 }
  0x11   :  { %v51_v44 = vadd.f32 %v50_v35, %v49_v38  ;;  %v119_v28 = vsel %vm34_vm1, %v90_v20, 0.0 }
  0x12   :  { %v106_v2 = vadd.f32 %v105_v58, %v104_v60  ;;  %v121_v31 = vsel %vm34_vm1, %v91_v24, 0.0 }
  0x13   :  { %v53_v50 = vadd.f32 %v52_v41, %v51_v44  ;;  %v75_v44 = vld [vmem:[%s260_s2] sm:$0x1] }
  0x14   :  { %v108_v8 = vadd.f32 %v107_v0, %v106_v2 }
  0x15   :  { %v55_v56 = vadd.f32 %v54_v47, %v53_v50 }
  0x16   :  { %v110_v14 = vadd.f32 %v109_v6, %v108_v8 }
  0x17   :  { %v57_v62 = vadd.f32 %v56_v53, %v55_v56 }
  0x18   :  { %v112_v18 = vadd.f32 %v111_v12, %v110_v14 }
  0x19   :  { %v59_v4 = vadd.f32 %v58_v59, %v57_v62 }
  0x1a   :  { %v114_v22 = vadd.f32 %v113_v17, %v112_v18 }
  0x1b   :  { %v61_v10 = vadd.f32 %v60_v1, %v59_v4 }
  0x1c   :  { %v116_v26 = vadd.f32 %v115_v21, %v114_v22 }
  0x1d   :  { %v63_v15 = vadd.f32 %v62_v7, %v61_v10 }
  0x1e   :  { %v118_v29 = vadd.f32 %v117_v25, %v116_v26 }
  0x1f   :  { %v65_v19 = vadd.f32 %v64_v13, %v63_v15 }
  0x20   :  { %v120_v32 = vadd.f32 %v119_v28, %v118_v29 }
  0x21   :  { %v66_v23 = vrot.slane %v65_v19, 4 }
  0x22   :  { %v122_v34 = vadd.f32 %v121_v31, %v120_v32 }
  0x23   :  { %v67_v27 = vadd.f32 %v66_v23, %v65_v19 }
  0x24   :  { %v123_v37 = vrot.slane %v122_v34, 4 }
  0x25   :  { %v68_v30 = vrot.slane %v67_v27, 2 }
  0x26   :  { %v124_v39 = vadd.f32 %v123_v37, %v122_v34 }
  0x27   :  { %v69_v33 = vadd.f32 %v68_v30, %v67_v27 }
  0x28   :  { %v125_v41 = vrot.slane %v124_v39, 2 }
  0x29   :  { %v70_v35 = vrot.slane %v69_v33, 1 }
  0x2a   :  { %v126_v42 = vadd.f32 %v125_v41, %v124_v39 }
  0x2b   :  { %v71_v38 = vadd.f32 %v70_v35, %v69_v33 }
  0x2c   :  { %v127_v43 = vrot.slane %v126_v42, 1 }
  0x2d   :  { %v72_v40 = vadd.f32 %v71_v38, %v33_v36 }
  0x2e   :  { %v128_v45 = vadd.f32 %v127_v43, %v126_v42 }
  0x2f   :  { %74 = vst.msk [vmem:[%s259_s1] sm:$0x1] %vm14_vm0, %v72_v40 }
  0x30   :  { %v129_v46 = vadd.f32 %v128_v45, %v75_v44 }
  0x32   :  { %130 = vst.msk [vmem:[%s260_s2] sm:$0x1] %vm14_vm0, %v129_v46 }

// kernel: _lambda_.9
= control target key start
LH: loop header
LB: loop body
LE: loop exit
PB: predicated region body
PF: predicated region fallthrough
CT: control target
= control target key end

     0   :  { %vm86_vm0 = vcmask 523264   ;;  %s265_s0 = inlined_call_operand.vmem [shape: f32[128,64], index: 0, kind: input, shape index: {}]   ;;  %s266_s1 = inlined_call_operand.vmem [shape: f32[1,64], index: 1, kind: input, shape index: {}]   ;;  %s267_s2 = inlined_call_operand.vmem [shape: f32[1,64], index: 2, kind: input, shape index: {}]   ;;  %s268_s3 = inlined_call_operand.vmem [shape: f32[128,64], index: 3, kind: output, shape index: {}]  }
   0x1   :  { %v14_v0 = vld [vmem:[%s265_s0] sm:$0xff]  ;;  %v15_v3 = vld [vmem:[%s265_s0 + $0x8] sm:$0xff]  ;;  %v16_v6 = vld [vmem:[%s265_s0 + $0x10] sm:$0xff] }
   0x2   :  { %v107_v1 = vld [vmem:[%s266_s1] ss:$0 sm:$0xff]  ;;  %v17_v7 = vld [vmem:[%s265_s0 + $0x18] sm:$0xff]  ;;  %v19_v12 = vld [vmem:[%s265_s0 + $0x28] sm:$0xff] }
   0x3   :  { %v138_v2 = vld [vmem:[%s267_s2] ss:$0 sm:$0xff]  ;;  %v34_v4 = vmul.f32 %v107_v1, %v14_v0  ;;  %v35_v5 = vmul.f32 %v107_v1, %v15_v3  ;;  %v36_v9 = vmul.f32 %v107_v1, %v16_v6  ;;  %v37_v10 = vmul.f32 %v107_v1, %v17_v7  ;;  %v20_v13 = vld [vmem:[%s265_s0 + $0x30] sm:$0xff]  ;;  %v21_v14 = vld [vmem:[%s265_s0 + $0x38] sm:$0xff] }
   0x4   :  { %v18_v8 = vld [vmem:[%s265_s0 + $0x20] sm:$0xff]  ;;  %v39_v17 = vmul.f32 %v107_v1, %v19_v12  ;;  %v40_v18 = vmul.f32 %v107_v1, %v20_v13  ;;  %v41_v22 = vmul.f32 %v107_v1, %v21_v14  ;;  %v23_v24 = vld [vmem:[%s265_s0 + $0x48] sm:$0xff]  ;;  %v24_v29 = vld [vmem:[%s265_s0 + $0x50] sm:$0xff] }
   0x5   :  { %v38_v11 = vmul.f32 %v107_v1, %v18_v8  ;;  %v54_v15 = vadd.f32 %v138_v2, %v34_v4  ;;  %v55_v16 = vadd.f32 %v138_v2, %v35_v5  ;;  %v56_v19 = vadd.f32 %v138_v2, %v36_v9  ;;  %v22_v23 = vld [vmem:[%s265_s0 + $0x40] sm:$0xff]  ;;  %v25_v30 = vld [vmem:[%s265_s0 + $0x58] sm:$0xff]  ;;  %v27_v35 = vld [vmem:[%s265_s0 + $0x68] sm:$0xff] }
   0x6   :  { %v57_v20 = vadd.f32 %v138_v2, %v37_v10  ;;  %v59_v27 = vadd.f32 %v138_v2, %v39_v17  ;;  %v60_v28 = vadd.f32 %v138_v2, %v40_v18  ;;  %v26_v31 = vld [vmem:[%s265_s0 + $0x60] sm:$0xff]  ;;  %v61_v34 = vadd.f32 %v138_v2, %v41_v22  ;;  %v28_v36 = vld [vmem:[%s265_s0 + $0x70] sm:$0xff]  ;;  %v29_v41 = vld [vmem:[%s265_s0 + $0x78] sm:$0xff] }
   0x7   :  { %v58_v21 = vadd.f32 %v138_v2, %v38_v11  ;;  %v70_v25 = vmax.f32 %v54_v15, 0.0  ;;  %v71_v26 = vmax.f32 %v55_v16, 0.0  ;;  %v72_v32 = vmax.f32 %v56_v19, 0.0 }
   0x8   :  { %v73_v33 = vmax.f32 %v57_v20, 0.0  ;;  %v75_v38 = vmax.f32 %v59_v27, 0.0  ;;  %v42_v39 = vmul.f32 %v107_v1, %v22_v23  ;;  %v43_v40 = vmul.f32 %v107_v1, %v23_v24 }
   0x9   :  { %87 = vst.msk [vmem:[%s268_s3] sm:$0xff] %vm86_vm0, %v70_v25  ;;  %v74_v37 = vmax.f32 %v58_v21, 0.0  ;;  %v76_v42 = vmax.f32 %v60_v28, 0.0  ;;  %v44_v43 = vmul.f32 %v107_v1, %v24_v29  ;;  %v45_v44 = vmul.f32 %v107_v1, %v25_v30 }
   0xa   :  { %88 = vst.msk [vmem:[%s268_s3 + $0x8] sm:$0xff] %vm86_vm0, %v71_v26  ;;  %v46_v45 = vmul.f32 %v107_v1, %v26_v31  ;;  %v62_v46 = vadd.f32 %v138_v2, %v42_v39  ;;  %v63_v47 = vadd.f32 %v138_v2, %v43_v40  ;;  %v47_v48 = vmul.f32 %v107_v1, %v27_v35 }
   0xb   :  { %89 = vst.msk [vmem:[%s268_s3 + $0x10] sm:$0xff] %vm86_vm0, %v72_v32  ;;  %v48_v49 = vmul.f32 %v107_v1, %v28_v36  ;;  %v77_v50 = vmax.f32 %v61_v34, 0.0  ;;  %v64_v51 = vadd.f32 %v138_v2, %v44_v43  ;;  %v65_v52 = vadd.f32 %v138_v2, %v45_v44 }
   0xc   :  { %90 = vst.msk [vmem:[%s268_s3 + $0x18] sm:$0xff] %vm86_vm0, %v73_v33  ;;  %v49_v53 = vmul.f32 %v107_v1, %v29_v41  ;;  %v78_v54 = vmax.f32 %v62_v46, 0.0  ;;  %v66_v55 = vadd.f32 %v138_v2, %v46_v45  ;;  %v79_v56 = vmax.f32 %v63_v47, 0.0 }
   0xd   :  { %91 = vst.msk [vmem:[%s268_s3 + $0x20] sm:$0xff] %vm86_vm0, %v74_v37  ;;  %v67_v57 = vadd.f32 %v138_v2, %v47_v48  ;;  %v80_v58 = vmax.f32 %v64_v51, 0.0  ;;  %v68_v59 = vadd.f32 %v138_v2, %v48_v49  ;;  %v81_v60 = vmax.f32 %v65_v52, 0.0 }
   0xe   :  { %92 = vst.msk [vmem:[%s268_s3 + $0x28] sm:$0xff] %vm86_vm0, %v75_v38  ;;  %v69_v61 = vadd.f32 %v138_v2, %v49_v53  ;;  %v82_v62 = vmax.f32 %v66_v55, 0.0 }
   0xf   :  { %93 = vst.msk [vmem:[%s268_s3 + $0x30] sm:$0xff] %vm86_vm0, %v76_v42  ;;  %v83_v63 = vmax.f32 %v67_v57, 0.0  ;;  %v84_v0 = vmax.f32 %v68_v59, 0.0 }
  0x10   :  { %94 = vst.msk [vmem:[%s268_s3 + $0x38] sm:$0xff] %vm86_vm0, %v77_v50  ;;  %v85_v1 = vmax.f32 %v69_v61, 0.0 }
  0x11   :  { %95 = vst.msk [vmem:[%s268_s3 + $0x40] sm:$0xff] %vm86_vm0, %v78_v54 }
  0x12   :  { %96 = vst.msk [vmem:[%s268_s3 + $0x48] sm:$0xff] %vm86_vm0, %v79_v56 }
  0x13   :  { %97 = vst.msk [vmem:[%s268_s3 + $0x50] sm:$0xff] %vm86_vm0, %v80_v58 }
  0x14   :  { %98 = vst.msk [vmem:[%s268_s3 + $0x58] sm:$0xff] %vm86_vm0, %v81_v60 }
  0x15   :  { %99 = vst.msk [vmem:[%s268_s3 + $0x60] sm:$0xff] %vm86_vm0, %v82_v62 }
  0x16   :  { %100 = vst.msk [vmem:[%s268_s3 + $0x68] sm:$0xff] %vm86_vm0, %v83_v63 }
  0x17   :  { %101 = vst.msk [vmem:[%s268_s3 + $0x70] sm:$0xff] %vm86_vm0, %v84_v0 }
  0x18   :  { %102 = vst.msk [vmem:[%s268_s3 + $0x78] sm:$0xff] %vm86_vm0, %v85_v1 }

// kernel: _lambda_.7
= control target key start
LH: loop header
LB: loop body
LE: loop exit
PB: predicated region body
PF: predicated region fallthrough
CT: control target
= control target key end

     0   :  { %s873_s1 = inlined_call_operand.vmem [shape: bf16[256,128], index: 1, kind: input, shape index: {}]   ;;  %s874_s0 = inlined_call_operand.vmem [shape: bf16[128,256], index: 0, kind: input, shape index: {}]   ;;  %s875_s2 = inlined_call_operand.vmem [shape: f32[1,128], index: 2, kind: input, shape index: {}]   ;;  %s876_s3 = inlined_call_operand.vmem [shape: f32[128,128], index: 3, kind: output, shape index: {}]  }
   0x1   :  { %v614_v0 = vld [vmem:[%s873_s1 + $0x38] sm:$0xff]  ;;  %v613_v2 = vld [vmem:[%s873_s1 + $0x30] sm:$0xff]  ;;  %v612_v4 = vld [vmem:[%s873_s1 + $0x28] sm:$0xff] }
   0x2   :  { %v622_v1 = vld [vmem:[%s873_s1 + $0x78] sm:$0xff]  ;;  %274 = vmatpush.bf16.msra.mxu0 %v614_v0  ;;  %623 = vmatpush.bf16.msra.mxu2 %v614_v0  ;;  %v621_v3 = vld [vmem:[%s873_s1 + $0x70] sm:$0xff]  ;;  %v620_v5 = vld [vmem:[%s873_s1 + $0x68] sm:$0xff] }
   0x3   :  { %323 = vmatpush.bf16.msra.mxu1 %v622_v1  ;;  %631 = vmatpush.bf16.msra.mxu3 %v622_v1  ;;  %v611_v6 = vld [vmem:[%s873_s1 + $0x20] sm:$0xff]  ;;  %v610_v8 = vld [vmem:[%s873_s1 + $0x18] sm:$0xff]  ;;  %v609_v10 = vld [vmem:[%s873_s1 + $0x10] sm:$0xff] }
   0x4   :  { %v619_v7 = vld [vmem:[%s873_s1 + $0x60] sm:$0xff]  ;;  %v618_v9 = vld [vmem:[%s873_s1 + $0x58] sm:$0xff]  ;;  %v617_v11 = vld [vmem:[%s873_s1 + $0x50] sm:$0xff] }
   0x5   :  { %v608_v12 = vld [vmem:[%s873_s1 + $0x8] sm:$0xff]  ;;  %v607_v14 = vld [vmem:[%s873_s1] sm:$0xff]  ;;  %v473_v28 = vld [vmem:[%s874_s0 + $0x10] sm:$0xf] }
   0x6   :  { %275 = vmatpush.bf16.msra.mxu0 %v613_v2  ;;  %624 = vmatpush.bf16.msra.mxu2 %v613_v2  ;;  %v616_v13 = vld [vmem:[%s873_s1 + $0x48] sm:$0xff]  ;;  %v615_v15 = vld [vmem:[%s873_s1 + $0x40] sm:$0xff]  ;;  %v594_v29 = vld [vmem:[%s874_s0 + $0x14] sm:$0xf0] }
   0x7   :  { %324 = vmatpush.bf16.msra.mxu1 %v621_v3  ;;  %632 = vmatpush.bf16.msra.mxu3 %v621_v3  ;;  %v465_v16 = vld [vmem:[%s874_s0] sm:$0xf]  ;;  %v592_v17 = vld [vmem:[%s874_s0 + $0x4] sm:$0xf0]  ;;  %v591_v20 = vld [vmem:[%s874_s0 + $0x4] sm:$0xf]  ;;  %v474_v36 = vor.u32 %v594_v29, %v473_v28 }
   0x8   :  { %v497_v18 = vld [vmem:[%s874_s0 + $0x40] sm:$0xf]  ;;  %v600_v19 = vld [vmem:[%s874_s0 + $0x44] sm:$0xf0]  ;;  %v467_v21 = vld [vmem:[%s874_s0 + $0x8] sm:$0xf0]  ;;  %v466_v24 = vor.u32 %v592_v17, %v465_v16 }
   0x9   :  { %v599_v22 = vld [vmem:[%s874_s0 + $0x44] sm:$0xf]  ;;  %v499_v23 = vld [vmem:[%s874_s0 + $0x48] sm:$0xf0]  ;;  %v498_v25 = vor.u32 %v600_v19, %v497_v18  ;;  %v470_v26 = vor.u32 %v591_v20, %v467_v21  ;;  %v505_v30 = vld [vmem:[%s874_s0 + $0x50] sm:$0xf] }
   0xa   :  { %276 = vmatpush.bf16.msra.mxu0 %v612_v4  ;;  %625 = vmatpush.bf16.msra.mxu2 %v612_v4  ;;  %v502_v27 = vor.u32 %v599_v22, %v499_v23  ;;  %v602_v31 = vld [vmem:[%s874_s0 + $0x54] sm:$0xf0]  ;;  %v593_v32 = vld [vmem:[%s874_s0 + $0x14] sm:$0xf]  ;;  %v475_v33 = vld [vmem:[%s874_s0 + $0x18] sm:$0xf0] }
   0xb   :  { %325 = vmatpush.bf16.msra.mxu1 %v620_v5  ;;  %633 = vmatpush.bf16.msra.mxu3 %v620_v5  ;;  %v601_v34 = vld [vmem:[%s874_s0 + $0x54] sm:$0xf]  ;;  %v507_v35 = vld [vmem:[%s874_s0 + $0x58] sm:$0xf0]  ;;  %v506_v37 = vor.u32 %v602_v31, %v505_v30  ;;  %v478_v38 = vor.u32 %v593_v32, %v475_v33  ;;  %v481_v40 = vld [vmem:[%s874_s0 + $0x20] sm:$0xf] }
   0xc   :  { %v510_v39 = vor.u32 %v601_v34, %v507_v35  ;;  %v596_v41 = vld [vmem:[%s874_s0 + $0x24] sm:$0xf0]  ;;  %v513_v42 = vld [vmem:[%s874_s0 + $0x60] sm:$0xf]  ;;  %v595_v44 = vld [vmem:[%s874_s0 + $0x24] sm:$0xf] }
   0xd   :  { %v604_v43 = vld [vmem:[%s874_s0 + $0x64] sm:$0xf0]  ;;  %v483_v45 = vld [vmem:[%s874_s0 + $0x28] sm:$0xf0]  ;;  %v603_v46 = vld [vmem:[%s874_s0 + $0x64] sm:$0xf]  ;;  %v482_v48 = vor.u32 %v596_v41, %v481_v40 }
   0xe   :  { %277 = vmatpush.bf16.msra.mxu0 %v611_v6  ;;  %626 = vmatpush.bf16.msra.mxu2 %v611_v6  ;;  %v515_v47 = vld [vmem:[%s874_s0 + $0x68] sm:$0xf0]  ;;  %v514_v49 = vor.u32 %v604_v43, %v513_v42  ;;  %v486_v50 = vor.u32 %v595_v44, %v483_v45  ;;  %v489_v52 = vld [vmem:[%s874_s0 + $0x30] sm:$0xf]  ;;  %v598_v53 = vld [vmem:[%s874_s0 + $0x34] sm:$0xf0] }
   0xf   :  { %326 = vmatpush.bf16.msra.mxu1 %v619_v7  ;;  %634 = vmatpush.bf16.msra.mxu3 %v619_v7  ;;  %v518_v51 = vor.u32 %v603_v46, %v515_v47  ;;  %v521_v54 = vld [vmem:[%s874_s0 + $0x70] sm:$0xf]  ;;  %v606_v55 = vld [vmem:[%s874_s0 + $0x74] sm:$0xf0]  ;;  %v597_v56 = vld [vmem:[%s874_s0 + $0x34] sm:$0xf]  ;;  %v490_v60 = vor.u32 %v598_v53, %v489_v52 }
  0x10   :  { %v491_v57 = vld [vmem:[%s874_s0 + $0x38] sm:$0xf0]  ;;  %v605_v58 = vld [vmem:[%s874_s0 + $0x74] sm:$0xf]  ;;  %v522_v61 = vor.u32 %v606_v55, %v521_v54  ;;  %v807_v1 = vld [vmem:[%s875_s2] ss:$0 sm:$0xff] }
  0x11   :  { %v523_v59 = vld [vmem:[%s874_s0 + $0x78] sm:$0xf0]  ;;  %v494_v62 = vor.u32 %v597_v56, %v491_v57 }
  0x12   :  { %278 = vmatpush.bf16.msra.mxu0 %v610_v8  ;;  %627 = vmatpush.bf16.msra.mxu2 %v610_v8  ;;  %v526_v63 = vor.u32 %v605_v58, %v523_v59 }
  0x13   :  { %327 = vmatpush.bf16.msra.mxu1 %v618_v9  ;;  %635 = vmatpush.bf16.msra.mxu3 %v618_v9 }
  0x16   :  { %279 = vmatpush.bf16.msra.mxu0 %v609_v10  ;;  %628 = vmatpush.bf16.msra.mxu2 %v609_v10 }
  0x17   :  { %328 = vmatpush.bf16.msra.mxu1 %v617_v11  ;;  %636 = vmatpush.bf16.msra.mxu3 %v617_v11 }
  0x1a   :  { %280 = vmatpush.bf16.msra.mxu0 %v608_v12  ;;  %629 = vmatpush.bf16.msra.mxu2 %v608_v12 }
  0x1b   :  { %329 = vmatpush.bf16.msra.mxu1 %v616_v13  ;;  %637 = vmatpush.bf16.msra.mxu3 %v616_v13 }
  0x1e   :  { %281 = vmatpush.bf16.msra.mxu0 %v607_v14  ;;  %630 = vmatpush.bf16.msra.mxu2 %v607_v14 }
  0x1f   :  { %330 = vmatpush.bf16.msra.mxu1 %v615_v15  ;;  %638 = vmatpush.bf16.msra.mxu3 %v615_v15 }
  0x21   :  { %282 = vmatmul.bf16.vlgmr.msra.gmra.mxu0 %v466_v24  ;;  %302 = vmatmul.bf16.vlgmr.msra.gmra.mxu2 %v498_v25 }
  0x22   :  { %331 = vmatmul.bf16.vlgmr.msra.gmra.mxu1 %v470_v26  ;;  %351 = vmatmul.bf16.vlgmr.msra.gmra.mxu3 %v502_v27 }
  0x31   :  { %287 = vmatmul.bf16.gmra.mxu0 %v474_v36  ;;  %307 = vmatmul.bf16.gmra.mxu2 %v506_v37 }
  0x32   :  { %336 = vmatmul.bf16.gmra.mxu1 %v478_v38  ;;  %356 = vmatmul.bf16.gmra.mxu3 %v510_v39 }
  0x41   :  { %292 = vmatmul.bf16.gmra.mxu0 %v482_v48  ;;  %312 = vmatmul.bf16.gmra.mxu2 %v514_v49 }
  0x42   :  { %341 = vmatmul.bf16.gmra.mxu1 %v486_v50  ;;  %361 = vmatmul.bf16.gmra.mxu3 %v518_v51 }
  0x51   :  { %297 = vmatmul.bf16.gmra.mxu0 %v490_v60  ;;  %317 = vmatmul.bf16.gmra.mxu2 %v522_v61 }
  0x52   :  { %346 = vmatmul.bf16.gmra.mxu1 %v494_v62  ;;  %366 = vmatmul.bf16.gmra.mxu3 %v526_v63 }
  0x9e   :  { %v283_v0 = vpop.f32.mrf.mxu0 }
  0x9f   :  { %v332_v2 = vpop.f32.mrf.mxu1 }
  0xa0   :  { %v333_v3 = vadd.f32 %v332_v2, %v283_v0 }
  0xa2   :  { %v427_v4 = vadd.f32 %v807_v1, %v333_v3 }
  0xa4   :  { %443 = vst [vmem:[%s876_s3] sm:$0xff] %v427_v4  ;;  %v303_v5 = vpop.f32.mrf.mxu2 }
  0xa5   :  { %v352_v6 = vpop.f32.mrf.mxu3 }
  0xa6   :  { %v353_v7 = vadd.f32 %v352_v6, %v303_v5  ;;  %v285_v8 = vpop.f32.mrf.mxu0 }
  0xa7   :  { %v334_v9 = vpop.f32.mrf.mxu1 }
  0xa8   :  { %v435_v10 = vadd.f32 %v807_v1, %v353_v7  ;;  %v335_v11 = vadd.f32 %v334_v9, %v285_v8 }
  0xaa   :  { %451 = vst [vmem:[%s876_s3 + $0x40] sm:$0xff] %v435_v10  ;;  %v428_v12 = vadd.f32 %v807_v1, %v335_v11 }
  0xac   :  { %444 = vst [vmem:[%s876_s3 + $0x8] sm:$0xff] %v428_v12  ;;  %v305_v13 = vpop.f32.mrf.mxu2 }
  0xad   :  { %v354_v14 = vpop.f32.mrf.mxu3 }
  0xae   :  { %v355_v15 = vadd.f32 %v354_v14, %v305_v13  ;;  %v288_v16 = vpop.f32.mrf.mxu0 }
  0xaf   :  { %v337_v17 = vpop.f32.mrf.mxu1 }
  0xb0   :  { %v436_v18 = vadd.f32 %v807_v1, %v355_v15  ;;  %v338_v19 = vadd.f32 %v337_v17, %v288_v16 }
  0xb2   :  { %452 = vst [vmem:[%s876_s3 + $0x48] sm:$0xff] %v436_v18  ;;  %v429_v20 = vadd.f32 %v807_v1, %v338_v19 }
  0xb4   :  { %445 = vst [vmem:[%s876_s3 + $0x10] sm:$0xff] %v429_v20  ;;  %v308_v21 = vpop.f32.mrf.mxu2 }
  0xb5   :  { %v357_v22 = vpop.f32.mrf.mxu3 }
  0xb6   :  { %v358_v23 = vadd.f32 %v357_v22, %v308_v21  ;;  %v290_v24 = vpop.f32.mrf.mxu0 }
  0xb7   :  { %v339_v25 = vpop.f32.mrf.mxu1 }
  0xb8   :  { %v437_v26 = vadd.f32 %v807_v1, %v358_v23  ;;  %v340_v27 = vadd.f32 %v339_v25, %v290_v24 }
  0xba   :  { %453 = vst [vmem:[%s876_s3 + $0x50] sm:$0xff] %v437_v26  ;;  %v430_v28 = vadd.f32 %v807_v1, %v340_v27 }
  0xbc   :  { %446 = vst [vmem:[%s876_s3 + $0x18] sm:$0xff] %v430_v28  ;;  %v310_v29 = vpop.f32.mrf.mxu2 }
  0xbd   :  { %v359_v30 = vpop.f32.mrf.mxu3 }
  0xbe   :  { %v360_v31 = vadd.f32 %v359_v30, %v310_v29  ;;  %v293_v32 = vpop.f32.mrf.mxu0 }
  0xbf   :  { %v342_v33 = vpop.f32.mrf.mxu1 }
  0xc0   :  { %v438_v34 = vadd.f32 %v807_v1, %v360_v31  ;;  %v343_v35 = vadd.f32 %v342_v33, %v293_v32 }
  0xc2   :  { %454 = vst [vmem:[%s876_s3 + $0x58] sm:$0xff] %v438_v34  ;;  %v431_v36 = vadd.f32 %v807_v1, %v343_v35 }
  0xc4   :  { %447 = vst [vmem:[%s876_s3 + $0x20] sm:$0xff] %v431_v36  ;;  %v313_v37 = vpop.f32.mrf.mxu2 }
  0xc5   :  { %v362_v38 = vpop.f32.mrf.mxu3 }
  0xc6   :  { %v363_v39 = vadd.f32 %v362_v38, %v313_v37  ;;  %v295_v40 = vpop.f32.mrf.mxu0 }
  0xc7   :  { %v344_v41 = vpop.f32.mrf.mxu1 }
  0xc8   :  { %v439_v42 = vadd.f32 %v807_v1, %v363_v39  ;;  %v345_v43 = vadd.f32 %v344_v41, %v295_v40 }
  0xca   :  { %455 = vst [vmem:[%s876_s3 + $0x60] sm:$0xff] %v439_v42  ;;  %v432_v44 = vadd.f32 %v807_v1, %v345_v43 }
  0xcc   :  { %448 = vst [vmem:[%s876_s3 + $0x28] sm:$0xff] %v432_v44  ;;  %v315_v45 = vpop.f32.mrf.mxu2 }
  0xcd   :  { %v364_v46 = vpop.f32.mrf.mxu3 }
  0xce   :  { %v365_v47 = vadd.f32 %v364_v46, %v315_v45  ;;  %v298_v48 = vpop.f32.mrf.mxu0 }
  0xcf   :  { %v347_v49 = vpop.f32.mrf.mxu1 }
  0xd0   :  { %v440_v50 = vadd.f32 %v807_v1, %v365_v47  ;;  %v348_v51 = vadd.f32 %v347_v49, %v298_v48 }
  0xd2   :  { %456 = vst [vmem:[%s876_s3 + $0x68] sm:$0xff] %v440_v50  ;;  %v433_v52 = vadd.f32 %v807_v1, %v348_v51 }
  0xd4   :  { %449 = vst [vmem:[%s876_s3 + $0x30] sm:$0xff] %v433_v52  ;;  %v318_v53 = vpop.f32.mrf.mxu2 }
  0xd5   :  { %v367_v54 = vpop.f32.mrf.mxu3 }
  0xd6   :  { %v368_v55 = vadd.f32 %v367_v54, %v318_v53  ;;  %v300_v56 = vpop.f32.mrf.mxu0 }
  0xd7   :  { %v349_v57 = vpop.f32.mrf.mxu1 }
  0xd8   :  { %v441_v58 = vadd.f32 %v807_v1, %v368_v55  ;;  %v350_v59 = vadd.f32 %v349_v57, %v300_v56 }
  0xda   :  { %457 = vst [vmem:[%s876_s3 + $0x70] sm:$0xff] %v441_v58  ;;  %v434_v60 = vadd.f32 %v807_v1, %v350_v59 }
  0xdc   :  { %450 = vst [vmem:[%s876_s3 + $0x38] sm:$0xff] %v434_v60  ;;  %v320_v61 = vpop.f32.mrf.mxu2 }
  0xdd   :  { %v369_v62 = vpop.f32.mrf.mxu3 }
  0xde   :  { %v370_v63 = vadd.f32 %v369_v62, %v320_v61 }
  0xe0   :  { %v442_v0 = vadd.f32 %v807_v1, %v370_v63 }
  0xe2   :  { %458 = vst [vmem:[%s876_s3 + $0x78] sm:$0xff] %v442_v0 }

// kernel: _lambda_.10
= control target key start
LH: loop header
LB: loop body
LE: loop exit
PB: predicated region body
PF: predicated region fallthrough
CT: control target
= control target key end

     0   :  { %vm100_vm0 = vcmask 523264   ;;  %s283_s0 = inlined_call_operand.vmem [shape: f32[32,64], index: 0, kind: input, shape index: {}]   ;;  %s284_s1 = inlined_call_operand.vmem [shape: f32[32,64], index: 1, kind: input, shape index: {}]   ;;  %s285_s2 = inlined_call_operand.vmem [shape: f32[32,64], index: 2, kind: input, shape index: {}]   ;;  %s286_s3 = inlined_call_operand.vmem [shape: f32[32,64], index: 3, kind: input, shape index: {}]   ;;  %s287_s4 = inlined_call_operand.vmem [shape: f32[32,64], index: 4, kind: input, shape index: {}]   ;;  %s288_s5 = inlined_call_operand.vmem [shape: f32[32,64], index: 5, kind: input, shape index: {}]   ;;  %s289_s6 = inlined_call_operand.vmem [shape: f32[32,64], index: 6, kind: input, shape index: {}]   ;;  %s290_s7 = inlined_call_operand.vmem [shape: f32[32,64], index: 7, kind: input, shape index: {}]   ;;  %s291_s8 = inlined_call_operand.vmem [shape: f32[32,64], index: 8, kind: input, shape index: {}]   ;;  %s292_s9 = inlined_call_operand.vmem [shape: f32[32,64], index: 9, kind: output, shape index: {}]  }
   0x1   :  { %v32_v0 = vld [vmem:[%s283_s0] sm:$0xff]  ;;  %v33_v6 = vld [vmem:[%s283_s0 + $0x8] sm:$0xff]  ;;  %v34_v15 = vld [vmem:[%s283_s0 + $0x10] sm:$0xff] }
   0x2   :  { %v36_v1 = vld [vmem:[%s284_s1] sm:$0xff]  ;;  %v37_v7 = vld [vmem:[%s284_s1 + $0x8] sm:$0xff]  ;;  %v38_v16 = vld [vmem:[%s284_s1 + $0x10] sm:$0xff] }
   0x3   :  { %v44_v2 = vld [vmem:[%s285_s2] sm:$0xff]  ;;  %v40_v3 = vmax.f32 %v32_v0, %v36_v1  ;;  %v45_v8 = vld [vmem:[%s285_s2 + $0x8] sm:$0xff]  ;;  %v41_v10 = vmax.f32 %v33_v6, %v37_v7  ;;  %v46_v17 = vld [vmem:[%s285_s2 + $0x10] sm:$0xff]  ;;  %v42_v20 = vmax.f32 %v34_v15, %v38_v16 }
   0x4   :  { %v52_v4 = vld [vmem:[%s286_s3] sm:$0xff]  ;;  %v53_v13 = vld [vmem:[%s286_s3 + $0x8] sm:$0xff]  ;;  %v54_v24 = vld [vmem:[%s286_s3 + $0x10] sm:$0xff] }
   0x5   :  { %v48_v5 = vmax.f32 %v40_v3, %v44_v2  ;;  %v60_v9 = vld [vmem:[%s287_s4] sm:$0xff]  ;;  %v49_v14 = vmax.f32 %v41_v10, %v45_v8  ;;  %v61_v19 = vld [vmem:[%s287_s4 + $0x8] sm:$0xff]  ;;  %v50_v26 = vmax.f32 %v42_v20, %v46_v17  ;;  %v35_v27 = vld [vmem:[%s283_s0 + $0x18] sm:$0xff] }
   0x6   :  { %v68_v12 = vld [vmem:[%s288_s5] sm:$0xff]  ;;  %v69_v23 = vld [vmem:[%s288_s5 + $0x8] sm:$0xff]  ;;  %v39_v28 = vld [vmem:[%s284_s1 + $0x18] sm:$0xff] }
   0x7   :  { %v56_v11 = vmax.f32 %v48_v5, %v52_v4  ;;  %v76_v21 = vld [vmem:[%s289_s6] sm:$0xff]  ;;  %v57_v22 = vmax.f32 %v49_v14, %v53_v13  ;;  %v47_v29 = vld [vmem:[%s285_s2 + $0x18] sm:$0xff]  ;;  %v62_v32 = vld [vmem:[%s287_s4 + $0x10] sm:$0xff]  ;;  %v43_v33 = vmax.f32 %v35_v27, %v39_v28  ;;  %v58_v36 = vmax.f32 %v50_v26, %v54_v24 }
   0x8   :  { %v84_v30 = vld [vmem:[%s290_s7] sm:$0xff]  ;;  %v77_v35 = vld [vmem:[%s289_s6 + $0x8] sm:$0xff]  ;;  %v55_v37 = vld [vmem:[%s286_s3 + $0x18] sm:$0xff] }
   0x9   :  { %v64_v18 = vmax.f32 %v56_v11, %v60_v9  ;;  %v65_v31 = vmax.f32 %v57_v22, %v61_v19  ;;  %v92_v38 = vld [vmem:[%s291_s8] sm:$0xff]  ;;  %v70_v40 = vld [vmem:[%s288_s5 + $0x10] sm:$0xff]  ;;  %v51_v41 = vmax.f32 %v43_v33, %v47_v29  ;;  %v85_v43 = vld [vmem:[%s290_s7 + $0x8] sm:$0xff]  ;;  %v66_v44 = vmax.f32 %v58_v36, %v62_v32 }
   0xa   :  { %v63_v45 = vld [vmem:[%s287_s4 + $0x18] sm:$0xff]  ;;  %v78_v47 = vld [vmem:[%s289_s6 + $0x10] sm:$0xff]  ;;  %v93_v50 = vld [vmem:[%s291_s8 + $0x8] sm:$0xff] }
   0xb   :  { %v72_v25 = vmax.f32 %v64_v18, %v68_v12  ;;  %v73_v39 = vmax.f32 %v65_v31, %v69_v23  ;;  %v59_v48 = vmax.f32 %v51_v41, %v55_v37  ;;  %v74_v51 = vmax.f32 %v66_v44, %v70_v40  ;;  %v71_v52 = vld [vmem:[%s288_s5 + $0x18] sm:$0xff]  ;;  %v86_v54 = vld [vmem:[%s290_s7 + $0x10] sm:$0xff] }
   0xc   :  { %v79_v57 = vld [vmem:[%s289_s6 + $0x18] sm:$0xff]  ;;  %v94_v59 = vld [vmem:[%s291_s8 + $0x10] sm:$0xff] }
   0xd   :  { %v80_v34 = vmax.f32 %v72_v25, %v76_v21  ;;  %v81_v46 = vmax.f32 %v73_v39, %v77_v35  ;;  %v67_v55 = vmax.f32 %v59_v48, %v63_v45  ;;  %v82_v56 = vmax.f32 %v74_v51, %v78_v47  ;;  %v87_v62 = vld [vmem:[%s290_s7 + $0x18] sm:$0xff] }
   0xe   :  { %v95_v1 = vld [vmem:[%s291_s8 + $0x18] sm:$0xff] }
   0xf   :  { %v88_v42 = vmax.f32 %v80_v34, %v84_v30  ;;  %v89_v53 = vmax.f32 %v81_v46, %v85_v43  ;;  %v75_v60 = vmax.f32 %v67_v55, %v71_v52  ;;  %v90_v61 = vmax.f32 %v82_v56, %v86_v54 }
  0x11   :  { %v96_v49 = vmax.f32 %v88_v42, %v92_v38  ;;  %v97_v58 = vmax.f32 %v89_v53, %v93_v50  ;;  %v83_v63 = vmax.f32 %v75_v60, %v79_v57  ;;  %v98_v0 = vmax.f32 %v90_v61, %v94_v59 }
  0x13   :  { %101 = vst.msk [vmem:[%s292_s9] sm:$0xff] %vm100_vm0, %v96_v49  ;;  %v91_v2 = vmax.f32 %v83_v63, %v87_v62 }
  0x14   :  { %102 = vst.msk [vmem:[%s292_s9 + $0x8] sm:$0xff] %vm100_vm0, %v97_v58 }
  0x15   :  { %103 = vst.msk [vmem:[%s292_s9 + $0x10] sm:$0xff] %vm100_vm0, %v98_v0  ;;  %v99_v3 = vmax.f32 %v91_v2, %v95_v1 }
  0x17   :  { %104 = vst.msk [vmem:[%s292_s9 + $0x18] sm:$0xff] %vm100_vm0, %v99_v3 }

// kernel: _lambda_.12
= control target key start
LH: loop header
LB: loop body
LE: loop exit
PB: predicated region body
PF: predicated region fallthrough
CT: control target
= control target key end

     0   :  { %vm10_vm0 = vcmask 1043456   ;;  %v47_v2 = vmov 4.0   ;;  %vm36_vm2 = vcmask 1041409   ;;  %s67_s0 = inlined_call_operand.vmem [shape: f32[2,4,128], index: 0, kind: input, shape index: {}]   ;;  %s68_s1 = inlined_call_operand.vmem [shape: f32[2,128], index: 1, kind: output, shape index: {}]  }
   0x1   :  { %v8_v0 = vld [vmem:[%s67_s0] sm:$0xf]  ;;  %v9_v1 = vld [vmem:[%s67_s0 + $0x4] sm:$0xf]  ;;  %45 = vrcp.f32 %v47_v2 }
   0x2   :  { %v11_v3 = vsel %vm10_vm0, %v8_v0, 0.0  ;;  %v18_v4 = vsel %vm10_vm0, %v9_v1, 0.0 }
   0x3   :  { %v12_v5 = vrot.slane %v11_v3, 4  ;;  %v19_v6 = vrot.slane %v18_v4, 4 }
   0x5   :  { %v13_v7 = vadd.f32 %v12_v5, %v11_v3  ;;  %v20_v8 = vadd.f32 %v19_v6, %v18_v4 }
   0x7   :  { %v46_v9 = vpop.eup %45  ;;  %v14_v10 = vrot.slane %v13_v7, 2  ;;  %v21_v11 = vrot.slane %v20_v8, 2 }
   0x8   :  { %v26_v12 = vmul.f32 4.0, %v46_v9  ;;  %vm30_vm1 = vweird.f32 %v46_v9 }
   0x9   :  { %v15_v13 = vadd.f32 %v14_v10, %v13_v7  ;;  %v22_v14 = vadd.f32 %v21_v11, %v20_v8 }
   0xa   :  { %v27_v15 = vsub.f32 1.0, %v26_v12 }
   0xb   :  { %v16_v16 = vrot.slane %v15_v13, 1  ;;  %v23_v17 = vrot.slane %v22_v14, 1 }
   0xc   :  { %v28_v18 = vmul.f32 %v46_v9, %v27_v15 }
   0xd   :  { %v17_v19 = vadd.f32 %v16_v16, %v15_v13  ;;  %v24_v20 = vadd.f32 %v23_v17, %v22_v14 }
   0xe   :  { %v29_v21 = vadd.f32 %v46_v9, %v28_v18 }
  0x10   :  { %v31_v22 = vsel %vm30_vm1, %v46_v9, %v29_v21 }
  0x11   :  { %v32_v23 = vmul.f32 %v31_v22, %v17_v19  ;;  %v33_v24 = vmul.f32 %v31_v22, %v24_v20 }
  0x13   :  { %v37_v25 = vsel %vm36_vm2, %v33_v24, %v32_v23 }
  0x14   :  { %39 = vst [vmem:[%s68_s1] sm:$0x3] %v37_v25 }

// kernel: _lambda_.11
= control target key start
LH: loop header
LB: loop body
LE: loop exit
PB: predicated region body
PF: predicated region fallthrough
CT: control target
= control target key end

     0   :  { %s233_s1 = inlined_call_operand.vmem [shape: bf16[128,128], index: 1, kind: input, shape index: {}]   ;;  %s234_s2 = inlined_call_operand.vmem [shape: f32[1,128], index: 2, kind: input, shape index: {}]   ;;  %s235_s0 = inlined_call_operand.vmem [shape: bf16[16,128], index: 0, kind: input, shape index: {}]   ;;  %s236_s3 = inlined_call_operand.vmem [shape: f32[16,128], index: 3, kind: output, shape index: {}]  }
   0x1   :  { %v175_v0 = vld [vmem:[%s233_s1 + $0x38] sm:$0xff]  ;;  %v174_v1 = vld [vmem:[%s233_s1 + $0x30] sm:$0xff]  ;;  %v173_v2 = vld [vmem:[%s233_s1 + $0x28] sm:$0xff] }
   0x2   :  { %94 = vmatpush.bf16.msra.mxu0 %v175_v0  ;;  %v172_v3 = vld [vmem:[%s233_s1 + $0x20] sm:$0xff]  ;;  %v171_v4 = vld [vmem:[%s233_s1 + $0x18] sm:$0xff]  ;;  %v170_v5 = vld [vmem:[%s233_s1 + $0x10] sm:$0xff] }
   0x3   :  { %v169_v6 = vld [vmem:[%s233_s1 + $0x8] sm:$0xff]  ;;  %v168_v7 = vld [vmem:[%s233_s1] sm:$0xff] }
   0x4   :  { %v167_v8 = vld [vmem:[%s235_s0] sm:$0xff] }
   0x5   :  { %v176_v9 = vld [vmem:[%s234_s2] ss:$0 sm:$0xff] }
   0x6   :  { %95 = vmatpush.bf16.msra.mxu0 %v174_v1 }
   0xa   :  { %96 = vmatpush.bf16.msra.mxu0 %v173_v2 }
   0xe   :  { %97 = vmatpush.bf16.msra.mxu0 %v172_v3 }
  0x12   :  { %98 = vmatpush.bf16.msra.mxu0 %v171_v4 }
  0x16   :  { %99 = vmatpush.bf16.msra.mxu0 %v170_v5 }
  0x1a   :  { %100 = vmatpush.bf16.msra.mxu0 %v169_v6 }
  0x1e   :  { %101 = vmatpush.bf16.msra.mxu0 %v168_v7 }
  0x21   :  { %102 = vmatmul.bf16.vlgmr.msra.gmra.mxu0 %v167_v8 }
  0x9e   :  { %v103_v10 = vpop.f32.mrf.mxu0 }
  0x9f   :  { %v121_v11 = vadd.f32 %v176_v9, %v103_v10 }
  0xa1   :  { %v123_v12 = vmax.f32 %v121_v11, 0.0 }
  0xa3   :  { %125 = vst [vmem:[%s236_s3] sm:$0xff] %v123_v12 }
  0xa6   :  { %v105_v13 = vpop.f32.mrf.mxu0 }
  0xa7   :  { %v122_v14 = vadd.f32 %v176_v9, %v105_v13 }
  0xa9   :  { %v124_v15 = vmax.f32 %v122_v14, 0.0 }
  0xab   :  { %126 = vst [vmem:[%s236_s3 + $0x8] sm:$0xff] %v124_v15 }

// kernel: _lambda_.13
= control target key start
LH: loop header
LB: loop body
LE: loop exit
PB: predicated region body
PF: predicated region fallthrough
CT: control target
= control target key end

     0   :  { %s231_s1 = inlined_call_operand.vmem [shape: bf16[128,128], index: 1, kind: input, shape index: {}]   ;;  %s232_s2 = inlined_call_operand.vmem [shape: f32[1,128], index: 2, kind: input, shape index: {}]   ;;  %s233_s0 = inlined_call_operand.vmem [shape: bf16[16,128], index: 0, kind: input, shape index: {}]   ;;  %s234_s3 = inlined_call_operand.vmem [shape: f32[16,128], index: 3, kind: output, shape index: {}]  }
   0x1   :  { %v173_v0 = vld [vmem:[%s231_s1 + $0x38] sm:$0xff]  ;;  %v172_v1 = vld [vmem:[%s231_s1 + $0x30] sm:$0xff]  ;;  %v171_v2 = vld [vmem:[%s231_s1 + $0x28] sm:$0xff] }
   0x2   :  { %94 = vmatpush.bf16.msra.mxu0 %v173_v0  ;;  %v170_v3 = vld [vmem:[%s231_s1 + $0x20] sm:$0xff]  ;;  %v169_v4 = vld [vmem:[%s231_s1 + $0x18] sm:$0xff]  ;;  %v168_v5 = vld [vmem:[%s231_s1 + $0x10] sm:$0xff] }
   0x3   :  { %v167_v6 = vld [vmem:[%s231_s1 + $0x8] sm:$0xff]  ;;  %v166_v7 = vld [vmem:[%s231_s1] sm:$0xff] }
   0x4   :  { %v165_v8 = vld [vmem:[%s233_s0] sm:$0xff] }
   0x5   :  { %v174_v9 = vld [vmem:[%s232_s2] ss:$0 sm:$0xff] }
   0x6   :  { %95 = vmatpush.bf16.msra.mxu0 %v172_v1 }
   0xa   :  { %96 = vmatpush.bf16.msra.mxu0 %v171_v2 }
   0xe   :  { %97 = vmatpush.bf16.msra.mxu0 %v170_v3 }
  0x12   :  { %98 = vmatpush.bf16.msra.mxu0 %v169_v4 }
  0x16   :  { %99 = vmatpush.bf16.msra.mxu0 %v168_v5 }
  0x1a   :  { %100 = vmatpush.bf16.msra.mxu0 %v167_v6 }
  0x1e   :  { %101 = vmatpush.bf16.msra.mxu0 %v166_v7 }
  0x21   :  { %102 = vmatmul.bf16.vlgmr.msra.gmra.mxu0 %v165_v8 }
  0x9e   :  { %v103_v10 = vpop.f32.mrf.mxu0 }
  0x9f   :  { %v121_v11 = vadd.f32 %v174_v9, %v103_v10 }
  0xa1   :  { %123 = vst [vmem:[%s234_s3] sm:$0xff] %v121_v11 }
  0xa6   :  { %v105_v12 = vpop.f32.mrf.mxu0 }
  0xa7   :  { %v122_v13 = vadd.f32 %v174_v9, %v105_v12 }
  0xa9   :  { %124 = vst [vmem:[%s234_s3 + $0x8] sm:$0xff] %v122_v13 }

</bundles_post_ra>
